<compile_context>
chip_gen: v5e
topology: v5e:2x2
jax: 0.10.0
libtpu: 0.0.40
codegen_flags: <defaults>
</compile_context>

<pallas_src>
import jax
import jax.numpy as jnp
from jax.experimental import pallas as pl
from jax.experimental.pallas import tpu as pltpu

# ----------------------------- config -----------------------------
B = 2          # batch
S = 8          # sequence length
BS = B * S
VOCAB = 128    # vocab size
D = 32         # d_model
H = 2          # attention heads
DH = D // H    # head dim
DFF = 64       # FFN hidden
N_LAYERS = 2   # encoder layers
MAX_LEN = 16   # max position embeddings
LN_EPS = 1e-12
VW = 3 * D     # lane width of the packed per-layer vector buffer (>= DFF, D)

VMEM_SPEC = pl.BlockSpec(memory_space=pltpu.MemorySpace.VMEM)


# ------------------------- in-kernel helpers -------------------------
def _layernorm(x, g, b):
    mu = jnp.mean(x, axis=-1, keepdims=True)
    var = jnp.mean(jnp.square(x - mu), axis=-1, keepdims=True)
    return (x - mu) * jax.lax.rsqrt(var + LN_EPS) * g + b


def _softmax_lastdim(s):
    m = jnp.max(s, axis=-1, keepdims=True)
    e = jnp.exp(s - m)
    return e * pl.reciprocal(jnp.sum(e, axis=-1, keepdims=True), approx=True)


def _erf(z):
    # Abramowitz & Stegun 7.1.26, |abs err| <= 1.5e-7: matches PyTorch's exact
    # erf GELU to f32 noise using only Pallas-TPU-supported elementwise ops.
    a1, a2, a3, a4, a5 = 0.254829592, -0.284496736, 1.421413741, -1.453152027, 1.061405429
    p = 0.3275911
    az = jnp.abs(z)
    t = 1.0 / (1.0 + p * az)
    poly = ((((a5 * t + a4) * t + a3) * t + a2) * t + a1) * t
    e = 1.0 - poly * jnp.exp(-az * az)
    return jnp.where(z < 0.0, -e, e)


def _gelu_exact(x):
    return 0.5 * x * (1.0 + _erf(x * 0.7071067811865476))


# ----------------------------- fused kernel -----------------------------
def _bert_mlm_kernel(ids_ref, tok_emb_ref, pos_ref, emb_ln_ref,
                     wqkv_ref, wo_ref, w1_ref, w2_ref, vecs_ref,
                     pred_w_ref, pred_b_ref,
                     scores_ref, probs_ref):
    f32 = jnp.float32

    # ---- embeddings: one-hot matmul gather + positions + LayerNorm ----
    ids = ids_ref[...]                                              # (BS, 1) int32
    vocab_iota = jax.lax.broadcasted_iota(jnp.int32, (BS, VOCAB), 1)
    onehot = (vocab_iota == ids).astype(f32)                        # (BS, VOCAB)
    x = jnp.dot(onehot, tok_emb_ref[...], preferred_element_type=f32)
    x = x + pos_ref[...]
    x = _layernorm(x, emb_ln_ref[0:1, :], emb_ln_ref[1:2, :])       # (BS, D)

    # ---- encoder layers (static unrolled loop, everything stays in VMEM) ----
    for l in range(N_LAYERS):
        vecs = vecs_ref[l]                                          # (8, VW)
        bqkv = vecs[0:1, 0:3 * D]
        bo = vecs[1:2, 0:D]
        ln1_g = vecs[2:3, 0:D]
        ln1_b = vecs[3:4, 0:D]
        b1 = vecs[4:5, 0:DFF]
        b2 = vecs[5:6, 0:D]
        ln2_g = vecs[6:7, 0:D]
        ln2_b = vecs[7:8, 0:D]

        # fused QKV projection (attention scale already folded into wq / bq)
        qkv = jnp.dot(x, wqkv_ref[l], preferred_element_type=f32) + bqkv
        q = qkv[:, 0:D]
        k = qkv[:, D:2 * D]
        v = qkv[:, 2 * D:3 * D]

        # multi-head attention: head split / merge fully in-kernel
        batch_ctx = []
        for bi in range(B):
            r0 = bi * S
            head_ctx = []
            for hi in range(H):
                c0 = hi * DH
                qb = q[r0:r0 + S, c0:c0 + DH]                       # (S, DH)
                kb = k[r0:r0 + S, c0:c0 + DH]
                vb = v[r0:r0 + S, c0:c0 + DH]
                s = jax.lax.dot_general(qb, kb, (((1,), (1,)), ((), ())),
                                        preferred_element_type=f32)  # (S, S)
                p = _softmax_lastdim(s)
                head_ctx.append(jnp.dot(p, vb, preferred_element_type=f32))
            batch_ctx.append(jnp.concatenate(head_ctx, axis=-1))    # (S, D)
        ctx = jnp.concatenate(batch_ctx, axis=0)                    # (BS, D)

        attn_out = jnp.dot(ctx, wo_ref[l], preferred_element_type=f32) + bo
        x = _layernorm(x + attn_out, ln1_g, ln1_b)

        ffn = jnp.dot(x, w1_ref[l], preferred_element_type=f32) + b1
        ffn = _gelu_exact(ffn)
        ffn = jnp.dot(ffn, w2_ref[l], preferred_element_type=f32) + b2
        x = _layernorm(x + ffn, ln2_g, ln2_b)

    # ---- MLM head: prediction linear + softmax over vocab (fused) ----
    scores = jnp.dot(x, pred_w_ref[...], preferred_element_type=f32) + pred_b_ref[...]
    scores_ref[...] = scores.astype(scores_ref.dtype)
    probs_ref[...] = _softmax_lastdim(scores).astype(probs_ref.dtype)


# ----------------------------- parameters -----------------------------
def init_params(key):
    keys = iter(jax.random.split(key, 128))

    def nrm(shape):
        return jax.random.normal(next(keys), shape, jnp.float32) * 0.02

    params = {
        "tok_emb": nrm((VOCAB, D)),
        "pos_emb": nrm((MAX_LEN, D)),
        "emb_ln_g": jnp.ones((D,), jnp.float32),
        "emb_ln_b": jnp.zeros((D,), jnp.float32),
        "layers": [],
    }
    for _ in range(N_LAYERS):
        params["layers"].append({
            "wq": nrm((D, D)), "bq": jnp.zeros((D,), jnp.float32),
            "wk": nrm((D, D)), "bk": jnp.zeros((D,), jnp.float32),
            "wv": nrm((D, D)), "bv": jnp.zeros((D,), jnp.float32),
            "wo": nrm((D, D)), "bo": jnp.zeros((D,), jnp.float32),
            "ln1_g": jnp.ones((D,), jnp.float32), "ln1_b": jnp.zeros((D,), jnp.float32),
            "w1": nrm((D, DFF)), "b1": jnp.zeros((DFF,), jnp.float32),
            "w2": nrm((DFF, D)), "b2": jnp.zeros((D,), jnp.float32),
            "ln2_g": jnp.ones((D,), jnp.float32), "ln2_b": jnp.zeros((D,), jnp.float32),
        })
    # prediction head: stored as [in, out] == PyTorch nn.Linear.weight.T
    params["pred_w"] = nrm((D, VOCAB))
    params["pred_b"] = jnp.zeros((VOCAB,), jnp.float32)
    return params


def pack_params(params):
    """One-time packing: concat QKV, fold attention scale, pack small vectors."""
    scale = 1.0 / float(DH) ** 0.5
    wqkv, wo, w1, w2, vecs = [], [], [], [], []
    for lp in params["layers"]:
        wqkv.append(jnp.concatenate([lp["wq"] * scale, lp["wk"], lp["wv"]], axis=1))
        wo.append(lp["wo"])
        w1.append(lp["w1"])
        w2.append(lp["w2"])
        vbuf = jnp.zeros((8, VW), jnp.float32)
        vbuf = vbuf.at[0, :3 * D].set(
            jnp.concatenate([lp["bq"] * scale, lp["bk"], lp["bv"]]))
        vbuf = vbuf.at[1, :D].set(lp["bo"])
        vbuf = vbuf.at[2, :D].set(lp["ln1_g"])
        vbuf = vbuf.at[3, :D].set(lp["ln1_b"])
        vbuf = vbuf.at[4, :DFF].set(lp["b1"])
        vbuf = vbuf.at[5, :D].set(lp["b2"])
        vbuf = vbuf.at[6, :D].set(lp["ln2_g"])
        vbuf = vbuf.at[7, :D].set(lp["ln2_b"])
        vecs.append(vbuf)
    return {
        "tok_emb": params["tok_emb"],                                   # (VOCAB, D)
        "pos": jnp.tile(params["pos_emb"][:S], (B, 1)),                 # (BS, D)
        "emb_ln": jnp.stack([params["emb_ln_g"], params["emb_ln_b"]]),  # (2, D)
        "wqkv": jnp.stack(wqkv),                                        # (L, D, 3D)
        "wo": jnp.stack(wo),                                            # (L, D, D)
        "w1": jnp.stack(w1),                                            # (L, D, DFF)
        "w2": jnp.stack(w2),                                            # (L, DFF, D)
        "vecs": jnp.stack(vecs),                                        # (L, 8, VW)
        "pred_w": params["pred_w"],                                     # (D, VOCAB)
        "pred_b": params["pred_b"].reshape(1, VOCAB),                   # (1, VOCAB)
    }


# ----------------------------- model forward -----------------------------
def bert_for_mlm(fused, input_ids):
    ids = input_ids.reshape(BS, 1).astype(jnp.int32)
    scores, probs = pl.pallas_call(
        _bert_mlm_kernel,
        out_shape=(jax.ShapeDtypeStruct((BS, VOCAB), jnp.float32),
                   jax.ShapeDtypeStruct((BS, VOCAB), jnp.float32)),
        in_specs=[VMEM_SPEC] * 11,
        out_specs=(VMEM_SPEC, VMEM_SPEC),
    )(ids, fused["tok_emb"], fused["pos"], fused["emb_ln"],
      fused["wqkv"], fused["wo"], fused["w1"], fused["w2"], fused["vecs"],
      fused["pred_w"], fused["pred_b"])
    return scores.reshape(B, S, VOCAB), probs.reshape(B, S, VOCAB)


# ----------------------------- main -----------------------------
if __name__ == "__main__":
    key = jax.random.PRNGKey(0)
    pkey, dkey = jax.random.split(key)
    params = init_params(pkey)
    fused = pack_params(params)
    input_ids = jax.random.randint(dkey, (B, S), 0, VOCAB, dtype=jnp.int32)

    token_scores, token_probs = jax.jit(bert_for_mlm)(fused, input_ids)
    jax.block_until_ready((token_scores, token_probs))

    assert token_scores.shape == (B, S, VOCAB)
    assert token_probs.shape == (B, S, VOCAB)
    print("KERNEL_OK")
</pallas_src>

<mosaic_0001>
module attributes {stable_mosaic.version = 11 : i64} {
  func.func @_bert_mlm_kernel(%arg0: memref<16x1xi32, #tpu.memory_space<vmem>>, %arg1: memref<128x32xf32, #tpu.memory_space<vmem>>, %arg2: memref<16x32xf32, #tpu.memory_space<vmem>>, %arg3: memref<2x32xf32, #tpu.memory_space<vmem>>, %arg4: memref<2x32x96xf32, #tpu.memory_space<vmem>>, %arg5: memref<2x32x32xf32, #tpu.memory_space<vmem>>, %arg6: memref<2x32x64xf32, #tpu.memory_space<vmem>>, %arg7: memref<2x64x32xf32, #tpu.memory_space<vmem>>, %arg8: memref<2x8x96xf32, #tpu.memory_space<vmem>>, %arg9: memref<32x128xf32, #tpu.memory_space<vmem>>, %arg10: memref<1x128xf32, #tpu.memory_space<vmem>>, %arg11: memref<16x128xf32, #tpu.memory_space<vmem>>, %arg12: memref<16x128xf32, #tpu.memory_space<vmem>>) attributes {dimension_semantics = [], scalar_prefetch = 0 : i64, scratch_operands = 0 : i64, tpu.core_type = #tpu.core_type<tc>} {
    %c0 = arith.constant 0 : index
    %c0_0 = arith.constant 0 : index
    %0 = vector.load %arg0[%c0, %c0_0] : memref<16x1xi32, #tpu.memory_space<vmem>>, vector<16x1xi32>
    %1 = tpu.iota {dimensions = array<i32: 1>} : vector<16x128xi32>
    %2 = vector.broadcast %0 : vector<16x1xi32> to vector<16x128xi32>
    %3 = arith.cmpi eq, %1, %2 : vector<16x128xi32>
    %4 = arith.extui %3 : vector<16x128xi1> to vector<16x128xi32>
    %5 = arith.sitofp %4 : vector<16x128xi32> to vector<16x128xf32>
    %c0_1 = arith.constant 0 : index
    %c0_2 = arith.constant 0 : index
    %6 = vector.load %arg1[%c0_1, %c0_2] : memref<128x32xf32, #tpu.memory_space<vmem>>, vector<128x32xf32>
    %cst = arith.constant dense<0.000000e+00> : vector<16x32xf32>
    %7 = tpu.matmul %5, %6, %cst {dimension_numbers = #tpu.dot_dimension_numbers<[1], [0], [0], [1], [0, 0, 1, 1], [], []>} : vector<16x128xf32>, vector<128x32xf32>, vector<16x32xf32> -> vector<16x32xf32>
    %c0_3 = arith.constant 0 : index
    %c0_4 = arith.constant 0 : index
    %8 = vector.load %arg2[%c0_3, %c0_4] : memref<16x32xf32, #tpu.memory_space<vmem>>, vector<16x32xf32>
    %9 = arith.addf %7, %8 : vector<16x32xf32>
    %c0_5 = arith.constant 0 : index
    %c0_6 = arith.constant 0 : index
    %10 = vector.load %arg3[%c0_5, %c0_6] : memref<2x32xf32, #tpu.memory_space<vmem>>, vector<1x32xf32>
    %c1 = arith.constant 1 : index
    %c0_7 = arith.constant 0 : index
    %11 = vector.load %arg3[%c1, %c0_7] : memref<2x32xf32, #tpu.memory_space<vmem>>, vector<1x32xf32>
    %cst_8 = arith.constant dense<0.000000e+00> : vector<16xf32>
    %12 = vector.multi_reduction <add>, %9, %cst_8 [1] : vector<16x32xf32> to vector<16xf32>
    %13 = vector.shape_cast %12 : vector<16xf32> to vector<16x1xf32>
    %cst_9 = arith.constant 3.200000e+01 : f32
    %14 = vector.broadcast %cst_9 : f32 to vector<16x1xf32>
    %15 = arith.divf %13, %14 : vector<16x1xf32>
    %16 = vector.broadcast %15 : vector<16x1xf32> to vector<16x32xf32>
    %17 = arith.subf %9, %16 : vector<16x32xf32>
    %18 = arith.mulf %17, %17 : vector<16x32xf32>
    %cst_10 = arith.constant dense<0.000000e+00> : vector<16xf32>
    %19 = vector.multi_reduction <add>, %18, %cst_10 [1] : vector<16x32xf32> to vector<16xf32>
    %20 = vector.shape_cast %19 : vector<16xf32> to vector<16x1xf32>
    %cst_11 = arith.constant 3.200000e+01 : f32
    %21 = vector.broadcast %cst_11 : f32 to vector<16x1xf32>
    %22 = arith.divf %20, %21 : vector<16x1xf32>
    %23 = vector.broadcast %15 : vector<16x1xf32> to vector<16x32xf32>
    %24 = arith.subf %9, %23 : vector<16x32xf32>
    %cst_12 = arith.constant 9.99999996E-13 : f32
    %25 = vector.broadcast %cst_12 : f32 to vector<16x1xf32>
    %26 = arith.addf %22, %25 : vector<16x1xf32>
    %27 = math.rsqrt %26 : vector<16x1xf32>
    %28 = vector.broadcast %27 : vector<16x1xf32> to vector<16x32xf32>
    %29 = arith.mulf %24, %28 : vector<16x32xf32>
    %30 = vector.broadcast %10 : vector<1x32xf32> to vector<16x32xf32>
    %31 = arith.mulf %29, %30 : vector<16x32xf32>
    %32 = vector.broadcast %11 : vector<1x32xf32> to vector<16x32xf32>
    %33 = arith.addf %31, %32 : vector<16x32xf32>
    %c0_13 = arith.constant 0 : index
    %c0_14 = arith.constant 0 : index
    %c0_15 = arith.constant 0 : index
    %34 = vector.load %arg8[%c0_13, %c0_14, %c0_15] : memref<2x8x96xf32, #tpu.memory_space<vmem>>, vector<1x8x96xf32>
    %35 = vector.shape_cast %34 : vector<1x8x96xf32> to vector<8x96xf32>
    %36 = vector.extract_strided_slice %35 {offsets = [0, 0], sizes = [1, 96], strides = [1, 1]} : vector<8x96xf32> to vector<1x96xf32>
    %37 = vector.extract_strided_slice %35 {offsets = [1, 0], sizes = [1, 32], strides = [1, 1]} : vector<8x96xf32> to vector<1x32xf32>
    %38 = vector.extract_strided_slice %35 {offsets = [2, 0], sizes = [1, 32], strides = [1, 1]} : vector<8x96xf32> to vector<1x32xf32>
    %39 = vector.extract_strided_slice %35 {offsets = [3, 0], sizes = [1, 32], strides = [1, 1]} : vector<8x96xf32> to vector<1x32xf32>
    %40 = vector.extract_strided_slice %35 {offsets = [4, 0], sizes = [1, 64], strides = [1, 1]} : vector<8x96xf32> to vector<1x64xf32>
    %41 = vector.extract_strided_slice %35 {offsets = [5, 0], sizes = [1, 32], strides = [1, 1]} : vector<8x96xf32> to vector<1x32xf32>
    %42 = vector.extract_strided_slice %35 {offsets = [6, 0], sizes = [1, 32], strides = [1, 1]} : vector<8x96xf32> to vector<1x32xf32>
    %43 = vector.extract_strided_slice %35 {offsets = [7, 0], sizes = [1, 32], strides = [1, 1]} : vector<8x96xf32> to vector<1x32xf32>
    %c0_16 = arith.constant 0 : index
    %c0_17 = arith.constant 0 : index
    %c0_18 = arith.constant 0 : index
    %44 = vector.load %arg4[%c0_16, %c0_17, %c0_18] : memref<2x32x96xf32, #tpu.memory_space<vmem>>, vector<1x32x96xf32>
    %45 = vector.shape_cast %44 : vector<1x32x96xf32> to vector<32x96xf32>
    %cst_19 = arith.constant dense<0.000000e+00> : vector<16x96xf32>
    %46 = tpu.matmul %33, %45, %cst_19 {dimension_numbers = #tpu.dot_dimension_numbers<[1], [0], [0], [1], [0, 0, 1, 1], [], []>} : vector<16x32xf32>, vector<32x96xf32>, vector<16x96xf32> -> vector<16x96xf32>
    %47 = vector.broadcast %36 : vector<1x96xf32> to vector<16x96xf32>
    %48 = arith.addf %46, %47 : vector<16x96xf32>
    %49 = vector.extract_strided_slice %48 {offsets = [0, 0], sizes = [16, 32], strides = [1, 1]} : vector<16x96xf32> to vector<16x32xf32>
    %50 = vector.extract_strided_slice %48 {offsets = [0, 32], sizes = [16, 32], strides = [1, 1]} : vector<16x96xf32> to vector<16x32xf32>
    %51 = vector.extract_strided_slice %48 {offsets = [0, 64], sizes = [16, 32], strides = [1, 1]} : vector<16x96xf32> to vector<16x32xf32>
    %52 = vector.extract_strided_slice %49 {offsets = [0, 0], sizes = [8, 16], strides = [1, 1]} : vector<16x32xf32> to vector<8x16xf32>
    %53 = vector.extract_strided_slice %50 {offsets = [0, 0], sizes = [8, 16], strides = [1, 1]} : vector<16x32xf32> to vector<8x16xf32>
    %54 = vector.extract_strided_slice %51 {offsets = [0, 0], sizes = [8, 16], strides = [1, 1]} : vector<16x32xf32> to vector<8x16xf32>
    %cst_20 = arith.constant dense<0.000000e+00> : vector<8x8xf32>
    %55 = tpu.matmul %52, %53, %cst_20 {dimension_numbers = #tpu.dot_dimension_numbers<[1], [1], [0], [0], [0, 0, 1, 0], [], []>} : vector<8x16xf32>, vector<8x16xf32>, vector<8x8xf32> -> vector<8x8xf32>
    %cst_21 = arith.constant dense<0xFF800000> : vector<8xf32>
    %56 = vector.multi_reduction <maximumf>, %55, %cst_21 [1] : vector<8x8xf32> to vector<8xf32>
    %57 = vector.shape_cast %56 : vector<8xf32> to vector<8x1xf32>
    %58 = vector.broadcast %57 : vector<8x1xf32> to vector<8x8xf32>
    %59 = arith.subf %55, %58 : vector<8x8xf32>
    %60 = math.exp %59 : vector<8x8xf32>
    %cst_22 = arith.constant dense<0.000000e+00> : vector<8xf32>
    %61 = vector.multi_reduction <add>, %60, %cst_22 [1] : vector<8x8xf32> to vector<8xf32>
    %62 = vector.shape_cast %61 : vector<8xf32> to vector<8x1xf32>
    %63 = tpu.reciprocal %62 {approx = true} : vector<8x1xf32> -> vector<8x1xf32>
    %64 = vector.broadcast %63 : vector<8x1xf32> to vector<8x8xf32>
    %65 = arith.mulf %60, %64 : vector<8x8xf32>
    %cst_23 = arith.constant dense<0.000000e+00> : vector<8x16xf32>
    %66 = tpu.matmul %65, %54, %cst_23 {dimension_numbers = #tpu.dot_dimension_numbers<[1], [0], [0], [1], [0, 0, 1, 1], [], []>} : vector<8x8xf32>, vector<8x16xf32>, vector<8x16xf32> -> vector<8x16xf32>
    %67 = vector.extract_strided_slice %49 {offsets = [0, 16], sizes = [8, 16], strides = [1, 1]} : vector<16x32xf32> to vector<8x16xf32>
    %68 = vector.extract_strided_slice %50 {offsets = [0, 16], sizes = [8, 16], strides = [1, 1]} : vector<16x32xf32> to vector<8x16xf32>
    %69 = vector.extract_strided_slice %51 {offsets = [0, 16], sizes = [8, 16], strides = [1, 1]} : vector<16x32xf32> to vector<8x16xf32>
    %cst_24 = arith.constant dense<0.000000e+00> : vector<8x8xf32>
    %70 = tpu.matmul %67, %68, %cst_24 {dimension_numbers = #tpu.dot_dimension_numbers<[1], [1], [0], [0], [0, 0, 1, 0], [], []>} : vector<8x16xf32>, vector<8x16xf32>, vector<8x8xf32> -> vector<8x8xf32>
    %cst_25 = arith.constant dense<0xFF800000> : vector<8xf32>
    %71 = vector.multi_reduction <maximumf>, %70, %cst_25 [1] : vector<8x8xf32> to vector<8xf32>
    %72 = vector.shape_cast %71 : vector<8xf32> to vector<8x1xf32>
    %73 = vector.broadcast %72 : vector<8x1xf32> to vector<8x8xf32>
    %74 = arith.subf %70, %73 : vector<8x8xf32>
    %75 = math.exp %74 : vector<8x8xf32>
    %cst_26 = arith.constant dense<0.000000e+00> : vector<8xf32>
    %76 = vector.multi_reduction <add>, %75, %cst_26 [1] : vector<8x8xf32> to vector<8xf32>
    %77 = vector.shape_cast %76 : vector<8xf32> to vector<8x1xf32>
    %78 = tpu.reciprocal %77 {approx = true} : vector<8x1xf32> -> vector<8x1xf32>
    %79 = vector.broadcast %78 : vector<8x1xf32> to vector<8x8xf32>
    %80 = arith.mulf %75, %79 : vector<8x8xf32>
    %cst_27 = arith.constant dense<0.000000e+00> : vector<8x16xf32>
    %81 = tpu.matmul %80, %69, %cst_27 {dimension_numbers = #tpu.dot_dimension_numbers<[1], [0], [0], [1], [0, 0, 1, 1], [], []>} : vector<8x8xf32>, vector<8x16xf32>, vector<8x16xf32> -> vector<8x16xf32>
    %82 = tpu.concatenate %66, %81 in 1 : vector<8x16xf32>, vector<8x16xf32> -> vector<8x32xf32>
    %83 = vector.extract_strided_slice %49 {offsets = [8, 0], sizes = [8, 16], strides = [1, 1]} : vector<16x32xf32> to vector<8x16xf32>
    %84 = vector.extract_strided_slice %50 {offsets = [8, 0], sizes = [8, 16], strides = [1, 1]} : vector<16x32xf32> to vector<8x16xf32>
    %85 = vector.extract_strided_slice %51 {offsets = [8, 0], sizes = [8, 16], strides = [1, 1]} : vector<16x32xf32> to vector<8x16xf32>
    %cst_28 = arith.constant dense<0.000000e+00> : vector<8x8xf32>
    %86 = tpu.matmul %83, %84, %cst_28 {dimension_numbers = #tpu.dot_dimension_numbers<[1], [1], [0], [0], [0, 0, 1, 0], [], []>} : vector<8x16xf32>, vector<8x16xf32>, vector<8x8xf32> -> vector<8x8xf32>
    %cst_29 = arith.constant dense<0xFF800000> : vector<8xf32>
    %87 = vector.multi_reduction <maximumf>, %86, %cst_29 [1] : vector<8x8xf32> to vector<8xf32>
    %88 = vector.shape_cast %87 : vector<8xf32> to vector<8x1xf32>
    %89 = vector.broadcast %88 : vector<8x1xf32> to vector<8x8xf32>
    %90 = arith.subf %86, %89 : vector<8x8xf32>
    %91 = math.exp %90 : vector<8x8xf32>
    %cst_30 = arith.constant dense<0.000000e+00> : vector<8xf32>
    %92 = vector.multi_reduction <add>, %91, %cst_30 [1] : vector<8x8xf32> to vector<8xf32>
    %93 = vector.shape_cast %92 : vector<8xf32> to vector<8x1xf32>
    %94 = tpu.reciprocal %93 {approx = true} : vector<8x1xf32> -> vector<8x1xf32>
    %95 = vector.broadcast %94 : vector<8x1xf32> to vector<8x8xf32>
    %96 = arith.mulf %91, %95 : vector<8x8xf32>
    %cst_31 = arith.constant dense<0.000000e+00> : vector<8x16xf32>
    %97 = tpu.matmul %96, %85, %cst_31 {dimension_numbers = #tpu.dot_dimension_numbers<[1], [0], [0], [1], [0, 0, 1, 1], [], []>} : vector<8x8xf32>, vector<8x16xf32>, vector<8x16xf32> -> vector<8x16xf32>
    %98 = vector.extract_strided_slice %49 {offsets = [8, 16], sizes = [8, 16], strides = [1, 1]} : vector<16x32xf32> to vector<8x16xf32>
    %99 = vector.extract_strided_slice %50 {offsets = [8, 16], sizes = [8, 16], strides = [1, 1]} : vector<16x32xf32> to vector<8x16xf32>
    %100 = vector.extract_strided_slice %51 {offsets = [8, 16], sizes = [8, 16], strides = [1, 1]} : vector<16x32xf32> to vector<8x16xf32>
    %cst_32 = arith.constant dense<0.000000e+00> : vector<8x8xf32>
    %101 = tpu.matmul %98, %99, %cst_32 {dimension_numbers = #tpu.dot_dimension_numbers<[1], [1], [0], [0], [0, 0, 1, 0], [], []>} : vector<8x16xf32>, vector<8x16xf32>, vector<8x8xf32> -> vector<8x8xf32>
    %cst_33 = arith.constant dense<0xFF800000> : vector<8xf32>
    %102 = vector.multi_reduction <maximumf>, %101, %cst_33 [1] : vector<8x8xf32> to vector<8xf32>
    %103 = vector.shape_cast %102 : vector<8xf32> to vector<8x1xf32>
    %104 = vector.broadcast %103 : vector<8x1xf32> to vector<8x8xf32>
    %105 = arith.subf %101, %104 : vector<8x8xf32>
    %106 = math.exp %105 : vector<8x8xf32>
    %cst_34 = arith.constant dense<0.000000e+00> : vector<8xf32>
    %107 = vector.multi_reduction <add>, %106, %cst_34 [1] : vector<8x8xf32> to vector<8xf32>
    %108 = vector.shape_cast %107 : vector<8xf32> to vector<8x1xf32>
    %109 = tpu.reciprocal %108 {approx = true} : vector<8x1xf32> -> vector<8x1xf32>
    %110 = vector.broadcast %109 : vector<8x1xf32> to vector<8x8xf32>
    %111 = arith.mulf %106, %110 : vector<8x8xf32>
    %cst_35 = arith.constant dense<0.000000e+00> : vector<8x16xf32>
    %112 = tpu.matmul %111, %100, %cst_35 {dimension_numbers = #tpu.dot_dimension_numbers<[1], [0], [0], [1], [0, 0, 1, 1], [], []>} : vector<8x8xf32>, vector<8x16xf32>, vector<8x16xf32> -> vector<8x16xf32>
    %113 = tpu.concatenate %97, %112 in 1 : vector<8x16xf32>, vector<8x16xf32> -> vector<8x32xf32>
    %114 = tpu.concatenate %82, %113 in 0 : vector<8x32xf32>, vector<8x32xf32> -> vector<16x32xf32>
    %c0_36 = arith.constant 0 : index
    %c0_37 = arith.constant 0 : index
    %c0_38 = arith.constant 0 : index
    %115 = vector.load %arg5[%c0_36, %c0_37, %c0_38] : memref<2x32x32xf32, #tpu.memory_space<vmem>>, vector<1x32x32xf32>
    %116 = vector.shape_cast %115 : vector<1x32x32xf32> to vector<32x32xf32>
    %cst_39 = arith.constant dense<0.000000e+00> : vector<16x32xf32>
    %117 = tpu.matmul %114, %116, %cst_39 {dimension_numbers = #tpu.dot_dimension_numbers<[1], [0], [0], [1], [0, 0, 1, 1], [], []>} : vector<16x32xf32>, vector<32x32xf32>, vector<16x32xf32> -> vector<16x32xf32>
    %118 = vector.broadcast %37 : vector<1x32xf32> to vector<16x32xf32>
    %119 = arith.addf %117, %118 : vector<16x32xf32>
    %120 = arith.addf %33, %119 : vector<16x32xf32>
    %cst_40 = arith.constant dense<0.000000e+00> : vector<16xf32>
    %121 = vector.multi_reduction <add>, %120, %cst_40 [1] : vector<16x32xf32> to vector<16xf32>
    %122 = vector.shape_cast %121 : vector<16xf32> to vector<16x1xf32>
    %cst_41 = arith.constant 3.200000e+01 : f32
    %123 = vector.broadcast %cst_41 : f32 to vector<16x1xf32>
    %124 = arith.divf %122, %123 : vector<16x1xf32>
    %125 = vector.broadcast %124 : vector<16x1xf32> to vector<16x32xf32>
    %126 = arith.subf %120, %125 : vector<16x32xf32>
    %127 = arith.mulf %126, %126 : vector<16x32xf32>
    %cst_42 = arith.constant dense<0.000000e+00> : vector<16xf32>
    %128 = vector.multi_reduction <add>, %127, %cst_42 [1] : vector<16x32xf32> to vector<16xf32>
    %129 = vector.shape_cast %128 : vector<16xf32> to vector<16x1xf32>
    %cst_43 = arith.constant 3.200000e+01 : f32
    %130 = vector.broadcast %cst_43 : f32 to vector<16x1xf32>
    %131 = arith.divf %129, %130 : vector<16x1xf32>
    %132 = vector.broadcast %124 : vector<16x1xf32> to vector<16x32xf32>
    %133 = arith.subf %120, %132 : vector<16x32xf32>
    %cst_44 = arith.constant 9.99999996E-13 : f32
    %134 = vector.broadcast %cst_44 : f32 to vector<16x1xf32>
    %135 = arith.addf %131, %134 : vector<16x1xf32>
    %136 = math.rsqrt %135 : vector<16x1xf32>
    %137 = vector.broadcast %136 : vector<16x1xf32> to vector<16x32xf32>
    %138 = arith.mulf %133, %137 : vector<16x32xf32>
    %139 = vector.broadcast %38 : vector<1x32xf32> to vector<16x32xf32>
    %140 = arith.mulf %138, %139 : vector<16x32xf32>
    %141 = vector.broadcast %39 : vector<1x32xf32> to vector<16x32xf32>
    %142 = arith.addf %140, %141 : vector<16x32xf32>
    %c0_45 = arith.constant 0 : index
    %c0_46 = arith.constant 0 : index
    %c0_47 = arith.constant 0 : index
    %143 = vector.load %arg6[%c0_45, %c0_46, %c0_47] : memref<2x32x64xf32, #tpu.memory_space<vmem>>, vector<1x32x64xf32>
    %144 = vector.shape_cast %143 : vector<1x32x64xf32> to vector<32x64xf32>
    %cst_48 = arith.constant dense<0.000000e+00> : vector<16x64xf32>
    %145 = tpu.matmul %142, %144, %cst_48 {dimension_numbers = #tpu.dot_dimension_numbers<[1], [0], [0], [1], [0, 0, 1, 1], [], []>} : vector<16x32xf32>, vector<32x64xf32>, vector<16x64xf32> -> vector<16x64xf32>
    %146 = vector.broadcast %40 : vector<1x64xf32> to vector<16x64xf32>
    %147 = arith.addf %145, %146 : vector<16x64xf32>
    %cst_49 = arith.constant 5.000000e-01 : f32
    %148 = vector.broadcast %cst_49 : f32 to vector<16x64xf32>
    %149 = arith.mulf %148, %147 : vector<16x64xf32>
    %cst_50 = arith.constant 0.707106769 : f32
    %150 = vector.broadcast %cst_50 : f32 to vector<16x64xf32>
    %151 = arith.mulf %147, %150 : vector<16x64xf32>
    %152 = math.absf %151 : vector<16x64xf32>
    %cst_51 = arith.constant 0.327591091 : f32
    %153 = vector.broadcast %cst_51 : f32 to vector<16x64xf32>
    %154 = arith.mulf %153, %152 : vector<16x64xf32>
    %cst_52 = arith.constant 1.000000e+00 : f32
    %155 = vector.broadcast %cst_52 : f32 to vector<16x64xf32>
    %156 = arith.addf %155, %154 : vector<16x64xf32>
    %cst_53 = arith.constant 1.000000e+00 : f32
    %157 = vector.broadcast %cst_53 : f32 to vector<16x64xf32>
    %158 = arith.divf %157, %156 : vector<16x64xf32>
    %cst_54 = arith.constant 1.06140542 : f32
    %159 = vector.broadcast %cst_54 : f32 to vector<16x64xf32>
    %160 = arith.mulf %159, %158 : vector<16x64xf32>
    %cst_55 = arith.constant -1.45315206 : f32
    %161 = vector.broadcast %cst_55 : f32 to vector<16x64xf32>
    %162 = arith.addf %160, %161 : vector<16x64xf32>
    %163 = arith.mulf %162, %158 : vector<16x64xf32>
    %cst_56 = arith.constant 1.42141378 : f32
    %164 = vector.broadcast %cst_56 : f32 to vector<16x64xf32>
    %165 = arith.addf %163, %164 : vector<16x64xf32>
    %166 = arith.mulf %165, %158 : vector<16x64xf32>
    %cst_57 = arith.constant -0.284496725 : f32
    %167 = vector.broadcast %cst_57 : f32 to vector<16x64xf32>
    %168 = arith.addf %166, %167 : vector<16x64xf32>
    %169 = arith.mulf %168, %158 : vector<16x64xf32>
    %cst_58 = arith.constant 0.254829586 : f32
    %170 = vector.broadcast %cst_58 : f32 to vector<16x64xf32>
    %171 = arith.addf %169, %170 : vector<16x64xf32>
    %172 = arith.mulf %171, %158 : vector<16x64xf32>
    %cst_59 = arith.constant 0.000000e+00 : f32
    %173 = vector.broadcast %cst_59 : f32 to vector<16x64xf32>
    %174 = arith.subf %173, %152 : vector<16x64xf32>
    %175 = arith.mulf %174, %152 : vector<16x64xf32>
    %176 = math.exp %175 : vector<16x64xf32>
    %177 = arith.mulf %172, %176 : vector<16x64xf32>
    %cst_60 = arith.constant 1.000000e+00 : f32
    %178 = vector.broadcast %cst_60 : f32 to vector<16x64xf32>
    %179 = arith.subf %178, %177 : vector<16x64xf32>
    %cst_61 = arith.constant 0.000000e+00 : f32
    %180 = vector.broadcast %cst_61 : f32 to vector<16x64xf32>
    %181 = arith.cmpf olt, %151, %180 : vector<16x64xf32>
    %cst_62 = arith.constant 0.000000e+00 : f32
    %182 = vector.broadcast %cst_62 : f32 to vector<16x64xf32>
    %183 = arith.subf %182, %179 : vector<16x64xf32>
    %184 = arith.select %181, %183, %179 : vector<16x64xi1>, vector<16x64xf32>
    %cst_63 = arith.constant 1.000000e+00 : f32
    %185 = vector.broadcast %cst_63 : f32 to vector<16x64xf32>
    %186 = arith.addf %185, %184 : vector<16x64xf32>
    %187 = arith.mulf %149, %186 : vector<16x64xf32>
    %c0_64 = arith.constant 0 : index
    %c0_65 = arith.constant 0 : index
    %c0_66 = arith.constant 0 : index
    %188 = vector.load %arg7[%c0_64, %c0_65, %c0_66] : memref<2x64x32xf32, #tpu.memory_space<vmem>>, vector<1x64x32xf32>
    %189 = vector.shape_cast %188 : vector<1x64x32xf32> to vector<64x32xf32>
    %cst_67 = arith.constant dense<0.000000e+00> : vector<16x32xf32>
    %190 = tpu.matmul %187, %189, %cst_67 {dimension_numbers = #tpu.dot_dimension_numbers<[1], [0], [0], [1], [0, 0, 1, 1], [], []>} : vector<16x64xf32>, vector<64x32xf32>, vector<16x32xf32> -> vector<16x32xf32>
    %191 = vector.broadcast %41 : vector<1x32xf32> to vector<16x32xf32>
    %192 = arith.addf %190, %191 : vector<16x32xf32>
    %193 = arith.addf %142, %192 : vector<16x32xf32>
    %cst_68 = arith.constant dense<0.000000e+00> : vector<16xf32>
    %194 = vector.multi_reduction <add>, %193, %cst_68 [1] : vector<16x32xf32> to vector<16xf32>
    %195 = vector.shape_cast %194 : vector<16xf32> to vector<16x1xf32>
    %cst_69 = arith.constant 3.200000e+01 : f32
    %196 = vector.broadcast %cst_69 : f32 to vector<16x1xf32>
    %197 = arith.divf %195, %196 : vector<16x1xf32>
    %198 = vector.broadcast %197 : vector<16x1xf32> to vector<16x32xf32>
    %199 = arith.subf %193, %198 : vector<16x32xf32>
    %200 = arith.mulf %199, %199 : vector<16x32xf32>
    %cst_70 = arith.constant dense<0.000000e+00> : vector<16xf32>
    %201 = vector.multi_reduction <add>, %200, %cst_70 [1] : vector<16x32xf32> to vector<16xf32>
    %202 = vector.shape_cast %201 : vector<16xf32> to vector<16x1xf32>
    %cst_71 = arith.constant 3.200000e+01 : f32
    %203 = vector.broadcast %cst_71 : f32 to vector<16x1xf32>
    %204 = arith.divf %202, %203 : vector<16x1xf32>
    %205 = vector.broadcast %197 : vector<16x1xf32> to vector<16x32xf32>
    %206 = arith.subf %193, %205 : vector<16x32xf32>
    %cst_72 = arith.constant 9.99999996E-13 : f32
    %207 = vector.broadcast %cst_72 : f32 to vector<16x1xf32>
    %208 = arith.addf %204, %207 : vector<16x1xf32>
    %209 = math.rsqrt %208 : vector<16x1xf32>
    %210 = vector.broadcast %209 : vector<16x1xf32> to vector<16x32xf32>
    %211 = arith.mulf %206, %210 : vector<16x32xf32>
    %212 = vector.broadcast %42 : vector<1x32xf32> to vector<16x32xf32>
    %213 = arith.mulf %211, %212 : vector<16x32xf32>
    %214 = vector.broadcast %43 : vector<1x32xf32> to vector<16x32xf32>
    %215 = arith.addf %213, %214 : vector<16x32xf32>
    %c1_73 = arith.constant 1 : index
    %c0_74 = arith.constant 0 : index
    %c0_75 = arith.constant 0 : index
    %216 = vector.load %arg8[%c1_73, %c0_74, %c0_75] : memref<2x8x96xf32, #tpu.memory_space<vmem>>, vector<1x8x96xf32>
    %217 = vector.shape_cast %216 : vector<1x8x96xf32> to vector<8x96xf32>
    %218 = vector.extract_strided_slice %217 {offsets = [0, 0], sizes = [1, 96], strides = [1, 1]} : vector<8x96xf32> to vector<1x96xf32>
    %219 = vector.extract_strided_slice %217 {offsets = [1, 0], sizes = [1, 32], strides = [1, 1]} : vector<8x96xf32> to vector<1x32xf32>
    %220 = vector.extract_strided_slice %217 {offsets = [2, 0], sizes = [1, 32], strides = [1, 1]} : vector<8x96xf32> to vector<1x32xf32>
    %221 = vector.extract_strided_slice %217 {offsets = [3, 0], sizes = [1, 32], strides = [1, 1]} : vector<8x96xf32> to vector<1x32xf32>
    %222 = vector.extract_strided_slice %217 {offsets = [4, 0], sizes = [1, 64], strides = [1, 1]} : vector<8x96xf32> to vector<1x64xf32>
    %223 = vector.extract_strided_slice %217 {offsets = [5, 0], sizes = [1, 32], strides = [1, 1]} : vector<8x96xf32> to vector<1x32xf32>
    %224 = vector.extract_strided_slice %217 {offsets = [6, 0], sizes = [1, 32], strides = [1, 1]} : vector<8x96xf32> to vector<1x32xf32>
    %225 = vector.extract_strided_slice %217 {offsets = [7, 0], sizes = [1, 32], strides = [1, 1]} : vector<8x96xf32> to vector<1x32xf32>
    %c1_76 = arith.constant 1 : index
    %c0_77 = arith.constant 0 : index
    %c0_78 = arith.constant 0 : index
    %226 = vector.load %arg4[%c1_76, %c0_77, %c0_78] : memref<2x32x96xf32, #tpu.memory_space<vmem>>, vector<1x32x96xf32>
    %227 = vector.shape_cast %226 : vector<1x32x96xf32> to vector<32x96xf32>
    %cst_79 = arith.constant dense<0.000000e+00> : vector<16x96xf32>
    %228 = tpu.matmul %215, %227, %cst_79 {dimension_numbers = #tpu.dot_dimension_numbers<[1], [0], [0], [1], [0, 0, 1, 1], [], []>} : vector<16x32xf32>, vector<32x96xf32>, vector<16x96xf32> -> vector<16x96xf32>
    %229 = vector.broadcast %218 : vector<1x96xf32> to vector<16x96xf32>
    %230 = arith.addf %228, %229 : vector<16x96xf32>
    %231 = vector.extract_strided_slice %230 {offsets = [0, 0], sizes = [16, 32], strides = [1, 1]} : vector<16x96xf32> to vector<16x32xf32>
    %232 = vector.extract_strided_slice %230 {offsets = [0, 32], sizes = [16, 32], strides = [1, 1]} : vector<16x96xf32> to vector<16x32xf32>
    %233 = vector.extract_strided_slice %230 {offsets = [0, 64], sizes = [16, 32], strides = [1, 1]} : vector<16x96xf32> to vector<16x32xf32>
    %234 = vector.extract_strided_slice %231 {offsets = [0, 0], sizes = [8, 16], strides = [1, 1]} : vector<16x32xf32> to vector<8x16xf32>
    %235 = vector.extract_strided_slice %232 {offsets = [0, 0], sizes = [8, 16], strides = [1, 1]} : vector<16x32xf32> to vector<8x16xf32>
    %236 = vector.extract_strided_slice %233 {offsets = [0, 0], sizes = [8, 16], strides = [1, 1]} : vector<16x32xf32> to vector<8x16xf32>
    %cst_80 = arith.constant dense<0.000000e+00> : vector<8x8xf32>
    %237 = tpu.matmul %234, %235, %cst_80 {dimension_numbers = #tpu.dot_dimension_numbers<[1], [1], [0], [0], [0, 0, 1, 0], [], []>} : vector<8x16xf32>, vector<8x16xf32>, vector<8x8xf32> -> vector<8x8xf32>
    %cst_81 = arith.constant dense<0xFF800000> : vector<8xf32>
    %238 = vector.multi_reduction <maximumf>, %237, %cst_81 [1] : vector<8x8xf32> to vector<8xf32>
    %239 = vector.shape_cast %238 : vector<8xf32> to vector<8x1xf32>
    %240 = vector.broadcast %239 : vector<8x1xf32> to vector<8x8xf32>
    %241 = arith.subf %237, %240 : vector<8x8xf32>
    %242 = math.exp %241 : vector<8x8xf32>
    %cst_82 = arith.constant dense<0.000000e+00> : vector<8xf32>
    %243 = vector.multi_reduction <add>, %242, %cst_82 [1] : vector<8x8xf32> to vector<8xf32>
    %244 = vector.shape_cast %243 : vector<8xf32> to vector<8x1xf32>
    %245 = tpu.reciprocal %244 {approx = true} : vector<8x1xf32> -> vector<8x1xf32>
    %246 = vector.broadcast %245 : vector<8x1xf32> to vector<8x8xf32>
    %247 = arith.mulf %242, %246 : vector<8x8xf32>
    %cst_83 = arith.constant dense<0.000000e+00> : vector<8x16xf32>
    %248 = tpu.matmul %247, %236, %cst_83 {dimension_numbers = #tpu.dot_dimension_numbers<[1], [0], [0], [1], [0, 0, 1, 1], [], []>} : vector<8x8xf32>, vector<8x16xf32>, vector<8x16xf32> -> vector<8x16xf32>
    %249 = vector.extract_strided_slice %231 {offsets = [0, 16], sizes = [8, 16], strides = [1, 1]} : vector<16x32xf32> to vector<8x16xf32>
    %250 = vector.extract_strided_slice %232 {offsets = [0, 16], sizes = [8, 16], strides = [1, 1]} : vector<16x32xf32> to vector<8x16xf32>
    %251 = vector.extract_strided_slice %233 {offsets = [0, 16], sizes = [8, 16], strides = [1, 1]} : vector<16x32xf32> to vector<8x16xf32>
    %cst_84 = arith.constant dense<0.000000e+00> : vector<8x8xf32>
    %252 = tpu.matmul %249, %250, %cst_84 {dimension_numbers = #tpu.dot_dimension_numbers<[1], [1], [0], [0], [0, 0, 1, 0], [], []>} : vector<8x16xf32>, vector<8x16xf32>, vector<8x8xf32> -> vector<8x8xf32>
    %cst_85 = arith.constant dense<0xFF800000> : vector<8xf32>
    %253 = vector.multi_reduction <maximumf>, %252, %cst_85 [1] : vector<8x8xf32> to vector<8xf32>
    %254 = vector.shape_cast %253 : vector<8xf32> to vector<8x1xf32>
    %255 = vector.broadcast %254 : vector<8x1xf32> to vector<8x8xf32>
    %256 = arith.subf %252, %255 : vector<8x8xf32>
    %257 = math.exp %256 : vector<8x8xf32>
    %cst_86 = arith.constant dense<0.000000e+00> : vector<8xf32>
    %258 = vector.multi_reduction <add>, %257, %cst_86 [1] : vector<8x8xf32> to vector<8xf32>
    %259 = vector.shape_cast %258 : vector<8xf32> to vector<8x1xf32>
    %260 = tpu.reciprocal %259 {approx = true} : vector<8x1xf32> -> vector<8x1xf32>
    %261 = vector.broadcast %260 : vector<8x1xf32> to vector<8x8xf32>
    %262 = arith.mulf %257, %261 : vector<8x8xf32>
    %cst_87 = arith.constant dense<0.000000e+00> : vector<8x16xf32>
    %263 = tpu.matmul %262, %251, %cst_87 {dimension_numbers = #tpu.dot_dimension_numbers<[1], [0], [0], [1], [0, 0, 1, 1], [], []>} : vector<8x8xf32>, vector<8x16xf32>, vector<8x16xf32> -> vector<8x16xf32>
    %264 = tpu.concatenate %248, %263 in 1 : vector<8x16xf32>, vector<8x16xf32> -> vector<8x32xf32>
    %265 = vector.extract_strided_slice %231 {offsets = [8, 0], sizes = [8, 16], strides = [1, 1]} : vector<16x32xf32> to vector<8x16xf32>
    %266 = vector.extract_strided_slice %232 {offsets = [8, 0], sizes = [8, 16], strides = [1, 1]} : vector<16x32xf32> to vector<8x16xf32>
    %267 = vector.extract_strided_slice %233 {offsets = [8, 0], sizes = [8, 16], strides = [1, 1]} : vector<16x32xf32> to vector<8x16xf32>
    %cst_88 = arith.constant dense<0.000000e+00> : vector<8x8xf32>
    %268 = tpu.matmul %265, %266, %cst_88 {dimension_numbers = #tpu.dot_dimension_numbers<[1], [1], [0], [0], [0, 0, 1, 0], [], []>} : vector<8x16xf32>, vector<8x16xf32>, vector<8x8xf32> -> vector<8x8xf32>
    %cst_89 = arith.constant dense<0xFF800000> : vector<8xf32>
    %269 = vector.multi_reduction <maximumf>, %268, %cst_89 [1] : vector<8x8xf32> to vector<8xf32>
    %270 = vector.shape_cast %269 : vector<8xf32> to vector<8x1xf32>
    %271 = vector.broadcast %270 : vector<8x1xf32> to vector<8x8xf32>
    %272 = arith.subf %268, %271 : vector<8x8xf32>
    %273 = math.exp %272 : vector<8x8xf32>
    %cst_90 = arith.constant dense<0.000000e+00> : vector<8xf32>
    %274 = vector.multi_reduction <add>, %273, %cst_90 [1] : vector<8x8xf32> to vector<8xf32>
    %275 = vector.shape_cast %274 : vector<8xf32> to vector<8x1xf32>
    %276 = tpu.reciprocal %275 {approx = true} : vector<8x1xf32> -> vector<8x1xf32>
    %277 = vector.broadcast %276 : vector<8x1xf32> to vector<8x8xf32>
    %278 = arith.mulf %273, %277 : vector<8x8xf32>
    %cst_91 = arith.constant dense<0.000000e+00> : vector<8x16xf32>
    %279 = tpu.matmul %278, %267, %cst_91 {dimension_numbers = #tpu.dot_dimension_numbers<[1], [0], [0], [1], [0, 0, 1, 1], [], []>} : vector<8x8xf32>, vector<8x16xf32>, vector<8x16xf32> -> vector<8x16xf32>
    %280 = vector.extract_strided_slice %231 {offsets = [8, 16], sizes = [8, 16], strides = [1, 1]} : vector<16x32xf32> to vector<8x16xf32>
    %281 = vector.extract_strided_slice %232 {offsets = [8, 16], sizes = [8, 16], strides = [1, 1]} : vector<16x32xf32> to vector<8x16xf32>
    %282 = vector.extract_strided_slice %233 {offsets = [8, 16], sizes = [8, 16], strides = [1, 1]} : vector<16x32xf32> to vector<8x16xf32>
    %cst_92 = arith.constant dense<0.000000e+00> : vector<8x8xf32>
    %283 = tpu.matmul %280, %281, %cst_92 {dimension_numbers = #tpu.dot_dimension_numbers<[1], [1], [0], [0], [0, 0, 1, 0], [], []>} : vector<8x16xf32>, vector<8x16xf32>, vector<8x8xf32> -> vector<8x8xf32>
    %cst_93 = arith.constant dense<0xFF800000> : vector<8xf32>
    %284 = vector.multi_reduction <maximumf>, %283, %cst_93 [1] : vector<8x8xf32> to vector<8xf32>
    %285 = vector.shape_cast %284 : vector<8xf32> to vector<8x1xf32>
    %286 = vector.broadcast %285 : vector<8x1xf32> to vector<8x8xf32>
    %287 = arith.subf %283, %286 : vector<8x8xf32>
    %288 = math.exp %287 : vector<8x8xf32>
    %cst_94 = arith.constant dense<0.000000e+00> : vector<8xf32>
    %289 = vector.multi_reduction <add>, %288, %cst_94 [1] : vector<8x8xf32> to vector<8xf32>
    %290 = vector.shape_cast %289 : vector<8xf32> to vector<8x1xf32>
    %291 = tpu.reciprocal %290 {approx = true} : vector<8x1xf32> -> vector<8x1xf32>
    %292 = vector.broadcast %291 : vector<8x1xf32> to vector<8x8xf32>
    %293 = arith.mulf %288, %292 : vector<8x8xf32>
    %cst_95 = arith.constant dense<0.000000e+00> : vector<8x16xf32>
    %294 = tpu.matmul %293, %282, %cst_95 {dimension_numbers = #tpu.dot_dimension_numbers<[1], [0], [0], [1], [0, 0, 1, 1], [], []>} : vector<8x8xf32>, vector<8x16xf32>, vector<8x16xf32> -> vector<8x16xf32>
    %295 = tpu.concatenate %279, %294 in 1 : vector<8x16xf32>, vector<8x16xf32> -> vector<8x32xf32>
    %296 = tpu.concatenate %264, %295 in 0 : vector<8x32xf32>, vector<8x32xf32> -> vector<16x32xf32>
    %c1_96 = arith.constant 1 : index
    %c0_97 = arith.constant 0 : index
    %c0_98 = arith.constant 0 : index
    %297 = vector.load %arg5[%c1_96, %c0_97, %c0_98] : memref<2x32x32xf32, #tpu.memory_space<vmem>>, vector<1x32x32xf32>
    %298 = vector.shape_cast %297 : vector<1x32x32xf32> to vector<32x32xf32>
    %cst_99 = arith.constant dense<0.000000e+00> : vector<16x32xf32>
    %299 = tpu.matmul %296, %298, %cst_99 {dimension_numbers = #tpu.dot_dimension_numbers<[1], [0], [0], [1], [0, 0, 1, 1], [], []>} : vector<16x32xf32>, vector<32x32xf32>, vector<16x32xf32> -> vector<16x32xf32>
    %300 = vector.broadcast %219 : vector<1x32xf32> to vector<16x32xf32>
    %301 = arith.addf %299, %300 : vector<16x32xf32>
    %302 = arith.addf %215, %301 : vector<16x32xf32>
    %cst_100 = arith.constant dense<0.000000e+00> : vector<16xf32>
    %303 = vector.multi_reduction <add>, %302, %cst_100 [1] : vector<16x32xf32> to vector<16xf32>
    %304 = vector.shape_cast %303 : vector<16xf32> to vector<16x1xf32>
    %cst_101 = arith.constant 3.200000e+01 : f32
    %305 = vector.broadcast %cst_101 : f32 to vector<16x1xf32>
    %306 = arith.divf %304, %305 : vector<16x1xf32>
    %307 = vector.broadcast %306 : vector<16x1xf32> to vector<16x32xf32>
    %308 = arith.subf %302, %307 : vector<16x32xf32>
    %309 = arith.mulf %308, %308 : vector<16x32xf32>
    %cst_102 = arith.constant dense<0.000000e+00> : vector<16xf32>
    %310 = vector.multi_reduction <add>, %309, %cst_102 [1] : vector<16x32xf32> to vector<16xf32>
    %311 = vector.shape_cast %310 : vector<16xf32> to vector<16x1xf32>
    %cst_103 = arith.constant 3.200000e+01 : f32
    %312 = vector.broadcast %cst_103 : f32 to vector<16x1xf32>
    %313 = arith.divf %311, %312 : vector<16x1xf32>
    %314 = vector.broadcast %306 : vector<16x1xf32> to vector<16x32xf32>
    %315 = arith.subf %302, %314 : vector<16x32xf32>
    %cst_104 = arith.constant 9.99999996E-13 : f32
    %316 = vector.broadcast %cst_104 : f32 to vector<16x1xf32>
    %317 = arith.addf %313, %316 : vector<16x1xf32>
    %318 = math.rsqrt %317 : vector<16x1xf32>
    %319 = vector.broadcast %318 : vector<16x1xf32> to vector<16x32xf32>
    %320 = arith.mulf %315, %319 : vector<16x32xf32>
    %321 = vector.broadcast %220 : vector<1x32xf32> to vector<16x32xf32>
    %322 = arith.mulf %320, %321 : vector<16x32xf32>
    %323 = vector.broadcast %221 : vector<1x32xf32> to vector<16x32xf32>
    %324 = arith.addf %322, %323 : vector<16x32xf32>
    %c1_105 = arith.constant 1 : index
    %c0_106 = arith.constant 0 : index
    %c0_107 = arith.constant 0 : index
    %325 = vector.load %arg6[%c1_105, %c0_106, %c0_107] : memref<2x32x64xf32, #tpu.memory_space<vmem>>, vector<1x32x64xf32>
    %326 = vector.shape_cast %325 : vector<1x32x64xf32> to vector<32x64xf32>
    %cst_108 = arith.constant dense<0.000000e+00> : vector<16x64xf32>
    %327 = tpu.matmul %324, %326, %cst_108 {dimension_numbers = #tpu.dot_dimension_numbers<[1], [0], [0], [1], [0, 0, 1, 1], [], []>} : vector<16x32xf32>, vector<32x64xf32>, vector<16x64xf32> -> vector<16x64xf32>
    %328 = vector.broadcast %222 : vector<1x64xf32> to vector<16x64xf32>
    %329 = arith.addf %327, %328 : vector<16x64xf32>
    %cst_109 = arith.constant 5.000000e-01 : f32
    %330 = vector.broadcast %cst_109 : f32 to vector<16x64xf32>
    %331 = arith.mulf %330, %329 : vector<16x64xf32>
    %cst_110 = arith.constant 0.707106769 : f32
    %332 = vector.broadcast %cst_110 : f32 to vector<16x64xf32>
    %333 = arith.mulf %329, %332 : vector<16x64xf32>
    %334 = math.absf %333 : vector<16x64xf32>
    %cst_111 = arith.constant 0.327591091 : f32
    %335 = vector.broadcast %cst_111 : f32 to vector<16x64xf32>
    %336 = arith.mulf %335, %334 : vector<16x64xf32>
    %cst_112 = arith.constant 1.000000e+00 : f32
    %337 = vector.broadcast %cst_112 : f32 to vector<16x64xf32>
    %338 = arith.addf %337, %336 : vector<16x64xf32>
    %cst_113 = arith.constant 1.000000e+00 : f32
    %339 = vector.broadcast %cst_113 : f32 to vector<16x64xf32>
    %340 = arith.divf %339, %338 : vector<16x64xf32>
    %cst_114 = arith.constant 1.06140542 : f32
    %341 = vector.broadcast %cst_114 : f32 to vector<16x64xf32>
    %342 = arith.mulf %341, %340 : vector<16x64xf32>
    %cst_115 = arith.constant -1.45315206 : f32
    %343 = vector.broadcast %cst_115 : f32 to vector<16x64xf32>
    %344 = arith.addf %342, %343 : vector<16x64xf32>
    %345 = arith.mulf %344, %340 : vector<16x64xf32>
    %cst_116 = arith.constant 1.42141378 : f32
    %346 = vector.broadcast %cst_116 : f32 to vector<16x64xf32>
    %347 = arith.addf %345, %346 : vector<16x64xf32>
    %348 = arith.mulf %347, %340 : vector<16x64xf32>
    %cst_117 = arith.constant -0.284496725 : f32
    %349 = vector.broadcast %cst_117 : f32 to vector<16x64xf32>
    %350 = arith.addf %348, %349 : vector<16x64xf32>
    %351 = arith.mulf %350, %340 : vector<16x64xf32>
    %cst_118 = arith.constant 0.254829586 : f32
    %352 = vector.broadcast %cst_118 : f32 to vector<16x64xf32>
    %353 = arith.addf %351, %352 : vector<16x64xf32>
    %354 = arith.mulf %353, %340 : vector<16x64xf32>
    %cst_119 = arith.constant 0.000000e+00 : f32
    %355 = vector.broadcast %cst_119 : f32 to vector<16x64xf32>
    %356 = arith.subf %355, %334 : vector<16x64xf32>
    %357 = arith.mulf %356, %334 : vector<16x64xf32>
    %358 = math.exp %357 : vector<16x64xf32>
    %359 = arith.mulf %354, %358 : vector<16x64xf32>
    %cst_120 = arith.constant 1.000000e+00 : f32
    %360 = vector.broadcast %cst_120 : f32 to vector<16x64xf32>
    %361 = arith.subf %360, %359 : vector<16x64xf32>
    %cst_121 = arith.constant 0.000000e+00 : f32
    %362 = vector.broadcast %cst_121 : f32 to vector<16x64xf32>
    %363 = arith.cmpf olt, %333, %362 : vector<16x64xf32>
    %cst_122 = arith.constant 0.000000e+00 : f32
    %364 = vector.broadcast %cst_122 : f32 to vector<16x64xf32>
    %365 = arith.subf %364, %361 : vector<16x64xf32>
    %366 = arith.select %363, %365, %361 : vector<16x64xi1>, vector<16x64xf32>
    %cst_123 = arith.constant 1.000000e+00 : f32
    %367 = vector.broadcast %cst_123 : f32 to vector<16x64xf32>
    %368 = arith.addf %367, %366 : vector<16x64xf32>
    %369 = arith.mulf %331, %368 : vector<16x64xf32>
    %c1_124 = arith.constant 1 : index
    %c0_125 = arith.constant 0 : index
    %c0_126 = arith.constant 0 : index
    %370 = vector.load %arg7[%c1_124, %c0_125, %c0_126] : memref<2x64x32xf32, #tpu.memory_space<vmem>>, vector<1x64x32xf32>
    %371 = vector.shape_cast %370 : vector<1x64x32xf32> to vector<64x32xf32>
    %cst_127 = arith.constant dense<0.000000e+00> : vector<16x32xf32>
    %372 = tpu.matmul %369, %371, %cst_127 {dimension_numbers = #tpu.dot_dimension_numbers<[1], [0], [0], [1], [0, 0, 1, 1], [], []>} : vector<16x64xf32>, vector<64x32xf32>, vector<16x32xf32> -> vector<16x32xf32>
    %373 = vector.broadcast %223 : vector<1x32xf32> to vector<16x32xf32>
    %374 = arith.addf %372, %373 : vector<16x32xf32>
    %375 = arith.addf %324, %374 : vector<16x32xf32>
    %cst_128 = arith.constant dense<0.000000e+00> : vector<16xf32>
    %376 = vector.multi_reduction <add>, %375, %cst_128 [1] : vector<16x32xf32> to vector<16xf32>
    %377 = vector.shape_cast %376 : vector<16xf32> to vector<16x1xf32>
    %cst_129 = arith.constant 3.200000e+01 : f32
    %378 = vector.broadcast %cst_129 : f32 to vector<16x1xf32>
    %379 = arith.divf %377, %378 : vector<16x1xf32>
    %380 = vector.broadcast %379 : vector<16x1xf32> to vector<16x32xf32>
    %381 = arith.subf %375, %380 : vector<16x32xf32>
    %382 = arith.mulf %381, %381 : vector<16x32xf32>
    %cst_130 = arith.constant dense<0.000000e+00> : vector<16xf32>
    %383 = vector.multi_reduction <add>, %382, %cst_130 [1] : vector<16x32xf32> to vector<16xf32>
    %384 = vector.shape_cast %383 : vector<16xf32> to vector<16x1xf32>
    %cst_131 = arith.constant 3.200000e+01 : f32
    %385 = vector.broadcast %cst_131 : f32 to vector<16x1xf32>
    %386 = arith.divf %384, %385 : vector<16x1xf32>
    %387 = vector.broadcast %379 : vector<16x1xf32> to vector<16x32xf32>
    %388 = arith.subf %375, %387 : vector<16x32xf32>
    %cst_132 = arith.constant 9.99999996E-13 : f32
    %389 = vector.broadcast %cst_132 : f32 to vector<16x1xf32>
    %390 = arith.addf %386, %389 : vector<16x1xf32>
    %391 = math.rsqrt %390 : vector<16x1xf32>
    %392 = vector.broadcast %391 : vector<16x1xf32> to vector<16x32xf32>
    %393 = arith.mulf %388, %392 : vector<16x32xf32>
    %394 = vector.broadcast %224 : vector<1x32xf32> to vector<16x32xf32>
    %395 = arith.mulf %393, %394 : vector<16x32xf32>
    %396 = vector.broadcast %225 : vector<1x32xf32> to vector<16x32xf32>
    %397 = arith.addf %395, %396 : vector<16x32xf32>
    %c0_133 = arith.constant 0 : index
    %c0_134 = arith.constant 0 : index
    %398 = vector.load %arg9[%c0_133, %c0_134] : memref<32x128xf32, #tpu.memory_space<vmem>>, vector<32x128xf32>
    %cst_135 = arith.constant dense<0.000000e+00> : vector<16x128xf32>
    %399 = tpu.matmul %397, %398, %cst_135 {dimension_numbers = #tpu.dot_dimension_numbers<[1], [0], [0], [1], [0, 0, 1, 1], [], []>} : vector<16x32xf32>, vector<32x128xf32>, vector<16x128xf32> -> vector<16x128xf32>
    %c0_136 = arith.constant 0 : index
    %c0_137 = arith.constant 0 : index
    %400 = vector.load %arg10[%c0_136, %c0_137] : memref<1x128xf32, #tpu.memory_space<vmem>>, vector<1x128xf32>
    %401 = vector.broadcast %400 : vector<1x128xf32> to vector<16x128xf32>
    %402 = arith.addf %399, %401 : vector<16x128xf32>
    %c0_138 = arith.constant 0 : index
    %c0_139 = arith.constant 0 : index
    %403 = vector.load %arg11[%c0_138, %c0_139] : memref<16x128xf32, #tpu.memory_space<vmem>>, vector<16x128xf32>
    tpu.vector_store %arg11[%c0_138, %c0_139], %402 {strides = array<i32>} : memref<16x128xf32, #tpu.memory_space<vmem>>, vector<16x128xf32>,
    %cst_140 = arith.constant dense<0xFF800000> : vector<16xf32>
    %404 = vector.multi_reduction <maximumf>, %402, %cst_140 [1] : vector<16x128xf32> to vector<16xf32>
    %405 = vector.shape_cast %404 : vector<16xf32> to vector<16x1xf32>
    %406 = vector.broadcast %405 : vector<16x1xf32> to vector<16x128xf32>
    %407 = arith.subf %402, %406 : vector<16x128xf32>
    %408 = math.exp %407 : vector<16x128xf32>
    %cst_141 = arith.constant dense<0.000000e+00> : vector<16xf32>
    %409 = vector.multi_reduction <add>, %408, %cst_141 [1] : vector<16x128xf32> to vector<16xf32>
    %410 = vector.shape_cast %409 : vector<16xf32> to vector<16x1xf32>
    %411 = tpu.reciprocal %410 {approx = true} : vector<16x1xf32> -> vector<16x1xf32>
    %412 = vector.broadcast %411 : vector<16x1xf32> to vector<16x128xf32>
    %413 = arith.mulf %408, %412 : vector<16x128xf32>
    %c0_142 = arith.constant 0 : index
    %c0_143 = arith.constant 0 : index
    %414 = vector.load %arg12[%c0_142, %c0_143] : memref<16x128xf32, #tpu.memory_space<vmem>>, vector<16x128xf32>
    tpu.vector_store %arg12[%c0_142, %c0_143], %413 {strides = array<i32>} : memref<16x128xf32, #tpu.memory_space<vmem>>, vector<16x128xf32>,
    return
  }
}

</mosaic_0001>

<bundles_post_ra>
// kernel: bert_for_mlm.1
= control target key start
LH: loop header
LB: loop body
LE: loop exit
PB: predicated region body
PF: predicated region fallthrough
CT: control target
= control target key end

     0   :  { %18 = vsyncpa [#allocation3], 0  ;;  %v1663_v3 = vmov 0   ;;  %s2153_s0 = inlined_call_operand.vmem [shape: s32[16,1], index: 0, kind: input, shape index: {}]   ;;  %s2154_s1 = inlined_call_operand.vmem [shape: f32[128,32], index: 1, kind: input, shape index: {}]   ;;  %s2155_s2 = inlined_call_operand.vmem [shape: f32[16,32], index: 2, kind: input, shape index: {}]   ;;  %s2156_s3 = inlined_call_operand.vmem [shape: f32[2,32], index: 3, kind: input, shape index: {}]   ;;  %s2157_s4 = inlined_call_operand.vmem [shape: f32[2,32,96], index: 4, kind: input, shape index: {}]   ;;  %s2158_s5 = inlined_call_operand.vmem [shape: f32[2,32,32], index: 5, kind: input, shape index: {}]   ;;  %s2159_s6 = inlined_call_operand.vmem [shape: f32[2,32,64], index: 6, kind: input, shape index: {}]   ;;  %s2160_s7 = inlined_call_operand.vmem [shape: f32[2,64,32], index: 7, kind: input, shape index: {}]   ;;  %s2161_s8 = inlined_call_operand.vmem [shape: f32[2,8,96], index: 8, kind: input, shape index: {}]   ;;  %s2162_s9 = inlined_call_operand.vmem [shape: f32[32,128], index: 9, kind: input, shape index: {}]   ;;  %s2163_s10 = inlined_call_operand.vmem [shape: f32[1,128], index: 10, kind: input, shape index: {}]   ;;  %s2164_s11 = inlined_call_operand.hbm [shape: f32[16,128], index: 11, kind: output, shape index: {0}]   ;;  %s2165_s12 = inlined_call_operand.hbm [shape: f32[16,128], index: 12, kind: output, shape index: {1}]  }
   0x1   :  { %v42_v0 = vld [vmem:[%s2153_s0] sm:$0xff]  ;;  %v73_v1 = vld [vmem:[%s2154_s1 + $0x78] sm:$0xff]  ;;  %v72_v2 = vld [vmem:[%s2154_s1 + $0x70] sm:$0xff]  ;;  %1528 = vset.pattern.permute.xlu0 %v1663_v3  ;;  %1529 = vset.pattern.permute.xlu1 %v1663_v3 }
   0x2   :  { %76 = vmatpush.msra.mxu0 %v73_v1  ;;  %47 = vperm.xlu0 %1528, %v42_v0   ;;  %v71_v4 = vld [vmem:[%s2154_s1 + $0x68] sm:$0xff]  ;;  %v70_v5 = vld [vmem:[%s2154_s1 + $0x60] sm:$0xff]  ;;  %v69_v6 = vld [vmem:[%s2154_s1 + $0x58] sm:$0xff] }
   0x4   :  { %77 = vmatpush.msra.mxu0 %v72_v2 }
   0x6   :  { %78 = vmatpush.msra.mxu0 %v71_v4 }
   0x7   :  { %19 = vsyncpa [#allocation5], 0  ;;  %v68_v7 = vld [vmem:[%s2154_s1 + $0x50] sm:$0xff]  ;;  %v67_v8 = vld [vmem:[%s2154_s1 + $0x48] sm:$0xff]  ;;  %v44_v18 = vlaneseq  ;;  %v1664_v21 = vmov 1.0   ;;  %vm101_vm1 = vcmask 261120  }
   0x8   :  { %79 = vmatpush.msra.mxu0 %v70_v5  ;;  %v66_v9 = vld [vmem:[%s2154_s1 + $0x40] sm:$0xff]  ;;  %v65_v10 = vld [vmem:[%s2154_s1 + $0x38] sm:$0xff]  ;;  %v64_v11 = vld [vmem:[%s2154_s1 + $0x30] sm:$0xff]  ;;  %v1665_v26 = vmov 32.0   ;;  %vm197_vm7 = vcmask 130048   ;;  %vm222_vm8 = vcmask 64512  }
   0x9   :  { %v63_v12 = vld [vmem:[%s2154_s1 + $0x28] sm:$0xff]  ;;  %v62_v13 = vld [vmem:[%s2154_s1 + $0x20] sm:$0xff]  ;;  %v61_v14 = vld [vmem:[%s2154_s1 + $0x18] sm:$0xff]  ;;  %v45_v19 = vand.u32 127, %v44_v18  ;;  %1533 = vrcp.f32 %v1665_v26  ;;  %s1668_s19 = smov 64   ;;  %s1669_s20 = smov 80  }
   0xa   :  { %80 = vmatpush.msra.mxu0 %v69_v6  ;;  %v60_v15 = vld [vmem:[%s2154_s1 + $0x10] sm:$0xff]  ;;  %v59_v16 = vld [vmem:[%s2154_s1 + $0x8] sm:$0xff]  ;;  %v58_v17 = vld [vmem:[%s2154_s1] sm:$0xff]  ;;  %s1670_s1 = smov 48   ;;  %s1671_s21 = smov 16  }
   0xb   :  { %v74_v22 = vld [vmem:[%s2155_s2] sm:$0xff]  ;;  %v43_v38 = vld [vmem:[%s2153_s0 + $0x8] sm:$0xff]  ;;  %v163_v39 = vld [vmem:[%s2157_s4 + $0x18] sm:$0xff]  ;;  %s1418_s22 = sshll.u32 %s2164_s11, 4  ;;  %s1673_s24 = smov 128   ;;  %s1419_s22 = int_to_ptr.hbm [resolvable:$true] %s1418_s22 }
   0xc   :  { %81 = vmatpush.msra.mxu0 %v68_v7  ;;  %183 = vmatpush.msra.mxu1 %v163_v39  ;;  %v162_v40 = vld [vmem:[%s2157_s4 + $0x10] sm:$0xff]  ;;  %v161_v41 = vld [vmem:[%s2157_s4 + $0x8] sm:$0xff]  ;;  %v160_v42 = vld [vmem:[%s2157_s4] sm:$0xff]  ;;  %s1674_s25 = smov 8   ;;  %s1675_s26 = smov [#allocation4]  }
   0xd   :  { %v1530_v52 = vld [vmem:[%s2156_s3] ss:$0 sm:$0xff]  ;;  %v1531_v55 = vld [vmem:[%s2156_s3 + $0x1] ss:$0 sm:$0xff]  ;;  %s1666_s3 = smov 96   ;;  %v75_v63 = vld [vmem:[%s2155_s2 + $0x8] sm:$0xff] }
   0xe   :  { %82 = vmatpush.msra.mxu0 %v67_v8  ;;  %184 = vmatpush.msra.mxu1 %v162_v40  ;;  %v1829_v59 = vld [vmem:[%s2161_s8] sm:$0xff]  ;;  %s1667_s2 = smov 112   ;;  %s1429_s27 = sshll.u32 %s1675_s26, 4  ;;  %s1430_s27 = int_to_ptr.vmem [resolvable:$true] %s1429_s27 }
   0xf   :  { %v1534_v27 = vpop.eup %1533  ;;  %v164_v60 = vperm.slane %v1829_v59, 0  ;;  %s1431_s29 = sshll.u32 %s2165_s12, 4  ;;  %s1432_s29 = int_to_ptr.hbm [resolvable:$true] %s1431_s29 }
  0x10   :  { %83 = vmatpush.msra.mxu0 %v66_v9  ;;  %v109_v28 = vmul.f32 32.0, %v1534_v27  ;;  %vm113_vm2 = vweird.f32 %v1534_v27  ;;  %185 = vmatpush.msra.mxu1 %v161_v41 }
  0x12   :  { %84 = vmatpush.msra.mxu0 %v65_v10  ;;  %v110_v29 = vsub.f32 1.0, %v109_v28  ;;  %186 = vmatpush.msra.mxu1 %v160_v42 }
  0x14   :  { %85 = vmatpush.msra.mxu0 %v64_v11  ;;  %v111_v30 = vmul.f32 %v1534_v27, %v110_v29 }
  0x16   :  { %86 = vmatpush.msra.mxu0 %v63_v12  ;;  %v112_v31 = vadd.f32 %v1534_v27, %v111_v30 }
  0x18   :  { %87 = vmatpush.msra.mxu0 %v62_v13  ;;  %v1796_v32 = vsel %vm113_vm2, %v1534_v27, %v112_v31 }
  0x1a   :  { %88 = vmatpush.msra.mxu0 %v61_v14 }
  0x1c   :  { %89 = vmatpush.msra.mxu0 %v60_v15 }
  0x1e   :  { %90 = vmatpush.msra.mxu0 %v59_v16 }
  0x20   :  { %91 = vmatpush.msra.mxu0 %v58_v17 }
  0x74   :  { %v48_v20 = vpop.permute.xlu0 %47 }
  0x75   :  { %vm52_vm0 = vcmp.eq.s32.totalorder %v45_v19, %v48_v20 }
  0x76   :  { %1450 = vmatmul.msk.f32.vlgmr.msra.gmra.mxu0 %vm52_vm0, %v1664_v21 }
  0xf3   :  { %v93_v23 = vpop.f32.mrf.mxu0 }
  0xf4   :  { %v94_v24 = vadd.f32 %v93_v23, %v74_v22 }
  0xf6   :  { %v102_v25 = vsel %vm101_vm1, %v94_v24, 0.0 }
  0xf7   :  { %103 = vadd.xlane.f32.xlu0 %v102_v25 }
 0x16a   :  { %v104_v33 = vpop.xlane.xlu0 %103 }
 0x16b   :  { %v115_v34 = vmul.f32 %v1796_v32, %v104_v33 }
 0x16d   :  { %v117_v35 = vsub.f32 %v94_v24, %v115_v34 }
 0x16f   :  { %v119_v36 = vmul.f32 %v117_v35, %v117_v35 }
 0x171   :  { %v121_v37 = vsel %vm101_vm1, %v119_v36, 0.0 }
 0x172   :  { %122 = vadd.xlane.f32.xlu1 %v121_v37 }
 0x18b   :  { %50 = vperm.xlu1 %1529, %v43_v38  }
 0x1e5   :  { %v123_v43 = vpop.xlane.xlu1 %122 }
 0x1e6   :  { %v127_v44 = vmul.f32 %v123_v43, %v1796_v32 }
 0x1e8   :  { %v129_v45 = vadd.f32 1e-12, %v127_v44 }
 0x1ea   :  { %1535 = vrsqrt.f32 %v129_v45  ;;  %vm137_vm4 = vweird.f32 %v129_v45 }
 0x1f0   :  { %v1536_v46 = vpop.eup %1535 }
 0x1f1   :  { %v132_v47 = vmul.f32 %v1536_v46, %v129_v45  ;;  %vm138_vm3 = vweird.f32 %v1536_v46 }
 0x1f2   :  { %vm139_vm5 = vmor %vm137_vm4, %vm138_vm3 }
 0x1f3   :  { %v133_v48 = vmul.f32 %v1536_v46, %v132_v47 }
 0x1f5   :  { %v134_v49 = vmul.f32 0.5, %v133_v48 }
 0x1f7   :  { %v135_v50 = vsub.f32 1.5, %v134_v49 }
 0x1f9   :  { %v136_v51 = vmul.f32 %v1536_v46, %v135_v50 }
 0x1fb   :  { %v140_v53 = vsel %vm139_vm5, %v1536_v46, %v136_v51 }
 0x1fc   :  { %v151_v54 = vmul.f32 %v140_v53, %v117_v35 }
 0x1fd   :  { %v51_v56 = vpop.permute.xlu1 %50 }
 0x1fe   :  { %v154_v57 = vmul.f32 %v1530_v52, %v151_v54  ;;  %vm53_vm6 = vcmp.eq.s32.totalorder %v45_v19, %v51_v56 }
 0x1ff   :  { %1451 = vmatmul.msk.f32.gmra.mxu0 %vm53_vm6, %v1664_v21 }
 0x200   :  { %v1822_v58 = vadd.f32 %v1531_v55, %v154_v57 }
 0x202   :  { %1452 = vmatmul.msk.f32.vlgmr.msra.gmra.mxu1 %vm101_vm1, %v1822_v58 }
 0x27c   :  { %v96_v0 = vpop.f32.mrf.mxu0 }
 0x27d   :  { %v97_v1 = vadd.f32 %v96_v0, %v75_v63 }
 0x27f   :  { %v188_v61 = vpop.f32.mrf.mxu1  ;;  %v105_v2 = vsel %vm101_vm1, %v97_v1, 0.0 }
 0x280   :  { %v1832_v62 = vadd.f32 %v188_v61, %v164_v60 }
 0x282   :  { %195 = vrot.lane.b32.xlu2 %v1832_v62, %s1666_s3 }
 0x2ab   :  { %106 = vadd.xlane.f32.xlu2 %v105_v2 }
 0x2dc   :  { %v196_v3 = vpop.permute.xlu2 %195 }
 0x2dd   :  { %1454 = vmatpush.xpose.msk.msra.mxu2 %vm197_vm7, %v196_v3 }
 0x2e0   :  { %1455 = vmatmul.msk.f32.vlgmr.msra.gmra.mxu2 %vm197_vm7, %v1832_v62 }
 0x31e   :  { %v107_v4 = vpop.xlane.xlu2 %106 }
 0x31f   :  { %v116_v5 = vmul.f32 %v1796_v32, %v107_v4 }
 0x321   :  { %v118_v6 = vsub.f32 %v97_v1, %v116_v5 }
 0x323   :  { %v120_v7 = vmul.f32 %v118_v6, %v118_v6 }
 0x325   :  { %v124_v8 = vsel %vm101_vm1, %v120_v7, 0.0 }
 0x326   :  { %125 = vadd.xlane.f32.xlu1 %v124_v8 }
 0x33f   :  { %260 = vrot.lane.b32.xlu1 %v1832_v62, %s1667_s2 }
 0x363   :  { %v219_v9 = vpop.f32.mrf.mxu2 }
 0x364   :  { %v223_v10 = vsel %vm222_vm8, %v219_v9, -inf }
 0x365   :  { %224 = vmax.xlane.f32.xlu2 %v223_v10 }
 0x37d   :  { %234 = vrot.lane.b32.xlu2 %v1832_v62, %s1668_s19 }
 0x399   :  { %v126_v11 = vpop.xlane.xlu1 %125 }
 0x39a   :  { %v128_v12 = vmul.f32 %v126_v11, %v1796_v32 }
 0x39c   :  { %v130_v13 = vadd.f32 1e-12, %v128_v12 }
 0x39e   :  { %1537 = vrsqrt.f32 %v130_v13  ;;  %vm147_vm10 = vweird.f32 %v130_v13 }
 0x3a4   :  { %v1538_v14 = vpop.eup %1537 }
 0x3a5   :  { %v142_v15 = vmul.f32 %v1538_v14, %v130_v13  ;;  %vm148_vm9 = vweird.f32 %v1538_v14 }
 0x3a6   :  { %vm149_vm11 = vmor %vm147_vm10, %vm148_vm9 }
 0x3a7   :  { %v143_v16 = vmul.f32 %v1538_v14, %v142_v15  ;;  %v466_v15 = vld [vmem:[%s2158_s5 + $0x10] sm:$0xff] }
 0x3a9   :  { %v144_v17 = vmul.f32 0.5, %v143_v16  ;;  %v465_v16 = vld [vmem:[%s2158_s5 + $0x8] sm:$0xff] }
 0x3ab   :  { %v145_v18 = vsub.f32 1.5, %v144_v17 }
 0x3ad   :  { %v146_v19 = vmul.f32 %v1538_v14, %v145_v18  ;;  %v464_v18 = vld [vmem:[%s2158_s5] sm:$0xff] }
 0x3af   :  { %v150_v20 = vsel %vm149_vm11, %v1538_v14, %v146_v19  ;;  %v467_v14 = vld [vmem:[%s2158_s5 + $0x18] sm:$0xff]  ;;  %vm673_vm11 = vcmask 523264  }
 0x3b0   :  { %v152_v21 = vmul.f32 %v150_v20, %v118_v6 }
 0x3b1   :  { %v261_v37 = vpop.permute.xlu1 %260 }
 0x3b2   :  { %v155_v22 = vmul.f32 %v1530_v52, %v152_v21 }
 0x3b4   :  { %v1851_v23 = vadd.f32 %v1531_v55, %v155_v22 }
 0x3b6   :  { %1453 = vmatmul.msk.f32.gmra.mxu1 %vm101_vm1, %v1851_v23 }
 0x3d8   :  { %v225_v24 = vpop.xlane.xlu2 %224 }
 0x3d9   :  { %v226_v25 = vsub.f32 %v219_v9, %v225_v24 }
 0x3db   :  { %v227_v26 = vmul.f32 1.442695, %v226_v25  ;;  %v468_v25 = vperm.slane %v1829_v59, 1 }
 0x3dd   :  { %1539 = vpow2.f32 %v227_v26 }
 0x3e0   :  { %v235_v27 = vpop.permute.xlu2 %234 }
 0x3e1   :  { %255 = vmatpush.msra.mxu3 %v235_v27 }
 0x3e3   :  { %v1540_v28 = vpop.eup %1539 }
 0x3e4   :  { %v229_v29 = vsel %vm222_vm8, %v1540_v28, 0.0 }
 0x3e5   :  { %230 = vadd.xlane.f32.xlu0 %v229_v29 }
 0x3f9   :  { %262 = vrot.lane.b32.xlu0 %v1832_v62, %s1669_s20 }
 0x433   :  { %v191_v30 = vpop.f32.mrf.mxu1 }
 0x434   :  { %v192_v31 = vadd.f32 %v191_v30, %v164_v60 }
 0x436   :  { %394 = vrot.lane.b32.xlu2 %v192_v31, %s1667_s2  ;;  %396 = vrot.lane.b32.xlu0 %v192_v31, %s1669_s20 }
 0x43e   :  { %331 = vrot.lane.b32.xlu0 %v192_v31, %s1666_s3 }
 0x458   :  { %v231_v33 = vpop.xlane.xlu0 %230 }
 0x459   :  { %1541 = vrcp.f32 %v231_v33 }
 0x45f   :  { %v1542_v34 = vpop.eup %1541 }
 0x460   :  { %v233_v35 = vmul.f32 %v1542_v34, %v1540_v28 }
 0x462   :  { %1456 = vmatmul.msk.f32.vlgmr.msra.gmra.mxu3 %vm222_vm8, %v233_v35 }
 0x46b   :  { %v263_v36 = vpop.permute.xlu0 %262 }
 0x46c   :  { %1457 = vmatpush.xpose.msk.msrb.mxu3 %vm197_vm7, %v263_v36 }
 0x46f   :  { %1458 = vmatmul.msk.f32.vlgmr.msrb.gmra.mxu3 %vm197_vm7, %v261_v37 }
 0x490   :  { %v395_v39 = vpop.permute.xlu2 %394 }
 0x4a8   :  { %v397_v38 = vpop.permute.xlu0 %396 }
 0x4a9   :  { %1463 = vmatpush.xpose.msk.msrb.mxu1 %vm197_vm7, %v397_v38 }
 0x4ac   :  { %1464 = vmatmul.msk.f32.vlgmr.msrb.gmra.mxu1 %vm197_vm7, %v395_v39 }
 0x4b0   :  { %v332_v40 = vpop.permute.xlu0 %331 }
 0x4b1   :  { %1460 = vmatpush.xpose.msk.msra.mxu3 %vm197_vm7, %v332_v40 }
 0x4b4   :  { %1461 = vmatmul.msk.f32.vlgmr.msra.gmra.mxu3 %vm197_vm7, %v192_v31 }
 0x4e5   :  { %v1868_v41 = vpop.f32.mrf.mxu3 }
 0x4f2   :  { %v285_v42 = vpop.f32.mrf.mxu3 }
 0x4f3   :  { %v288_v43 = vsel %vm222_vm8, %v285_v42, -inf }
 0x4f4   :  { %289 = vmax.xlane.f32.xlu2 %v288_v43 }
 0x50c   :  { %299 = vrot.lane.b32.xlu2 %v1832_v62, %s1670_s1 }
 0x514   :  { %368 = vrot.lane.b32.xlu2 %v192_v31, %s1668_s19 }
 0x529   :  { %v419_v44 = vpop.f32.mrf.mxu1 }
 0x52a   :  { %v422_v45 = vsel %vm222_vm8, %v419_v44, -inf }
 0x52b   :  { %423 = vmax.xlane.f32.xlu0 %v422_v45  ;;  %v551_v45 = vld [vmem:[%s2159_s6 + $0x8] sm:$0xff] }
 0x537   :  { %v354_v46 = vpop.f32.mrf.mxu3 }
 0x538   :  { %v357_v47 = vsel %vm222_vm8, %v354_v46, -inf }
 0x539   :  { %358 = vmax.xlane.f32.xlu0 %v357_v47 }
 0x54d   :  { %433 = vrot.lane.b32.xlu0 %v192_v31, %s1670_s1 }
 0x567   :  { %v290_v48 = vpop.xlane.xlu2 %289 }
 0x568   :  { %v291_v49 = vsub.f32 %v285_v42, %v290_v48 }
 0x56a   :  { %v292_v50 = vmul.f32 1.442695, %v291_v49 }
 0x56c   :  { %1543 = vpow2.f32 %v292_v50 }
 0x56f   :  { %v300_v51 = vpop.permute.xlu2 %299 }
 0x570   :  { %320 = vmatpush.msrb.mxu2 %v300_v51 }
 0x572   :  { %v1544_v52 = vpop.eup %1543 }
 0x573   :  { %v294_v53 = vsel %vm222_vm8, %v1544_v52, 0.0 }
 0x574   :  { %295 = vadd.xlane.f32.xlu1 %v294_v53 }
 0x577   :  { %v369_v54 = vpop.permute.xlu2 %368 }
 0x578   :  { %389 = vmatpush.msra.mxu2 %v369_v54 }
 0x59e   :  { %v424_v55 = vpop.xlane.xlu0 %423 }
 0x59f   :  { %v425_v56 = vsub.f32 %v419_v44, %v424_v55  ;;  %v552_v44 = vld [vmem:[%s2159_s6 + $0x10] sm:$0xff] }
 0x5a1   :  { %v426_v57 = vmul.f32 1.442695, %v425_v56  ;;  %v544_v56 = vperm.slane %v1829_v59, 2 }
 0x5a3   :  { %1545 = vpow2.f32 %v426_v57 }
 0x5a9   :  { %v1546_v60 = vpop.eup %1545 }
 0x5aa   :  { %v428_v61 = vsel %vm222_vm8, %v1546_v60, 0.0 }
 0x5ab   :  { %429 = vadd.xlane.f32.xlu1 %v428_v61  ;;  %v547_v61 = vperm.slane %v1829_v59, 3 }
 0x5ac   :  { %v359_v62 = vpop.xlane.xlu0 %358 }
 0x5ad   :  { %v360_v63 = vsub.f32 %v354_v46, %v359_v62  ;;  %v550_v46 = vld [vmem:[%s2159_s6] sm:$0xff] }
 0x5af   :  { %v361_v0 = vmul.f32 1.442695, %v360_v63 }
 0x5b1   :  { %1547 = vpow2.f32 %v361_v0 }
 0x5b7   :  { %v1548_v1 = vpop.eup %1547 }
 0x5b8   :  { %v363_v2 = vsel %vm222_vm8, %v1548_v1, 0.0 }
 0x5b9   :  { %364 = vadd.xlane.f32.xlu1 %v363_v2 }
 0x5bf   :  { %v434_v3 = vpop.permute.xlu0 %433 }
 0x5c0   :  { %454 = vmatpush.msrb.mxu3 %v434_v3 }
 0x5e7   :  { %v296_v4 = vpop.xlane.xlu1 %295 }
 0x5e8   :  { %1549 = vrcp.f32 %v296_v4 }
 0x5ee   :  { %v1550_v5 = vpop.eup %1549 }
 0x5ef   :  { %v298_v6 = vmul.f32 %v1550_v5, %v1544_v52 }
 0x5f1   :  { %1459 = vmatmul.msk.f32.vlgmr.msrb.gmra.mxu2 %vm222_vm8, %v298_v6 }
 0x5f2   :  { %487 = vmatpush.msrb.mxu2 %v467_v14 }
 0x5f4   :  { %488 = vmatpush.msrb.mxu2 %v466_v15 }
 0x5f6   :  { %489 = vmatpush.msrb.mxu2 %v465_v16 }
 0x5f8   :  { %490 = vmatpush.msrb.mxu2 %v464_v18 }
 0x61e   :  { %v430_v7 = vpop.xlane.xlu1 %429 }
 0x61f   :  { %1551 = vrcp.f32 %v430_v7 }
 0x625   :  { %v1552_v8 = vpop.eup %1551 }
 0x626   :  { %v432_v9 = vmul.f32 %v1552_v8, %v1546_v60 }
 0x628   :  { %1465 = vmatmul.msk.f32.vlgmr.msrb.gmra.mxu3 %vm222_vm8, %v432_v9 }
 0x62c   :  { %v365_v10 = vpop.xlane.xlu1 %364 }
 0x62d   :  { %1553 = vrcp.f32 %v365_v10 }
 0x633   :  { %v1554_v11 = vpop.eup %1553 }
 0x634   :  { %v367_v12 = vmul.f32 %v1554_v11, %v1548_v1 }
 0x636   :  { %1462 = vmatmul.msk.f32.vlgmr.msra.gmra.mxu2 %vm222_vm8, %v367_v12 }
 0x674   :  { %v322_v13 = vpop.f32.mrf.mxu2 }
 0x675   :  { %326 = vrot.lane.b32.xlu1 %v322_v13, %s1671_s21  ;;  %v554_v13 = vperm.slane %v1829_v59, 4 }
 0x6ab   :  { %v456_v17 = vpop.f32.mrf.mxu3 }
 0x6ac   :  { %460 = vrot.lane.b32.xlu2 %v456_v17, %s1671_s21 }
 0x6b9   :  { %v391_v21 = vpop.f32.mrf.mxu2 }
 0x6e7   :  { %v327_v19 = vpop.permute.xlu1 %326 }
 0x6e8   :  { %v329_v20 = vsel %vm197_vm7, %v1868_v41, %v327_v19 }
 0x6e9   :  { %1466 = vmatmul.msk.f32.vlgmr.msrb.gmra.mxu2 %vm101_vm1, %v329_v20  ;;  %v671_v20 = vld [vmem:[%s2160_s7 + $0x38] sm:$0xff] }
 0x6ea   :  { %688 = vmatpush.msra.mxu3 %v671_v20 }
 0x706   :  { %v461_v22 = vpop.permute.xlu2 %460 }
 0x707   :  { %v463_v24 = vsel %vm197_vm7, %v391_v21, %v461_v22  ;;  %v670_v21 = vld [vmem:[%s2160_s7 + $0x30] sm:$0xff]  ;;  %v669_v22 = vld [vmem:[%s2160_s7 + $0x28] sm:$0xff] }
 0x708   :  { %1467 = vmatmul.msk.f32.gmra.mxu2 %vm101_vm1, %v463_v24  ;;  %689 = vmatpush.msra.mxu3 %v670_v21  ;;  %v668_v24 = vld [vmem:[%s2160_s7 + $0x20] sm:$0xff] }
 0x70a   :  { %690 = vmatpush.msra.mxu3 %v669_v22 }
 0x70c   :  { %691 = vmatpush.msra.mxu3 %v668_v24 }
 0x76c   :  { %v492_v26 = vpop.f32.mrf.mxu2 }
 0x76d   :  { %v493_v27 = vadd.f32 %v492_v26, %v468_v25 }
 0x76f   :  { %v498_v28 = vadd.f32 %v493_v27, %v1822_v58  ;;  %v667_v27 = vld [vmem:[%s2160_s7 + $0x18] sm:$0xff] }
 0x770   :  { %692 = vmatpush.msra.mxu3 %v667_v27 }
 0x771   :  { %v500_v29 = vsel %vm101_vm1, %v498_v28, 0.0 }
 0x772   :  { %501 = vadd.xlane.f32.xlu0 %v500_v29  ;;  %v666_v29 = vld [vmem:[%s2160_s7 + $0x10] sm:$0xff] }
 0x773   :  { %693 = vmatpush.msra.mxu3 %v666_v29 }
 0x78b   :  { %v495_v30 = vpop.f32.mrf.mxu2 }
 0x78c   :  { %v496_v31 = vadd.f32 %v495_v30, %v468_v25 }
 0x78e   :  { %v499_v33 = vadd.f32 %v496_v31, %v1851_v23  ;;  %v553_v23 = vld [vmem:[%s2159_s6 + $0x18] sm:$0xff] }
 0x78f   :  { %573 = vmatpush.msra.mxu1 %v553_v23 }
 0x790   :  { %v503_v34 = vsel %vm101_vm1, %v499_v33, 0.0 }
 0x791   :  { %504 = vadd.xlane.f32.xlu2 %v503_v34  ;;  %574 = vmatpush.msra.mxu1 %v552_v44  ;;  %v665_v34 = vld [vmem:[%s2160_s7 + $0x8] sm:$0xff] }
 0x792   :  { %694 = vmatpush.msra.mxu3 %v665_v34 }
 0x793   :  { %575 = vmatpush.msra.mxu1 %v551_v45 }
 0x795   :  { %576 = vmatpush.msra.mxu1 %v550_v46 }
 0x7e5   :  { %v502_v35 = vpop.xlane.xlu0 %501 }
 0x7e6   :  { %v506_v36 = vmul.f32 %v502_v35, %v1796_v32  ;;  %v664_v35 = vld [vmem:[%s2160_s7] sm:$0xff] }
 0x7e7   :  { %695 = vmatpush.msra.mxu3 %v664_v35 }
 0x7e8   :  { %v508_v37 = vsub.f32 %v498_v28, %v506_v36 }
 0x7ea   :  { %v510_v38 = vmul.f32 %v508_v37, %v508_v37 }
 0x7ec   :  { %v512_v39 = vsel %vm101_vm1, %v510_v38, 0.0 }
 0x7ed   :  { %513 = vadd.xlane.f32.xlu1 %v512_v39 }
 0x804   :  { %v505_v40 = vpop.xlane.xlu2 %504 }
 0x805   :  { %v507_v58 = vmul.f32 %v505_v40, %v1796_v32 }
 0x807   :  { %v509_v41 = vsub.f32 %v499_v33, %v507_v58 }
 0x809   :  { %v511_v42 = vmul.f32 %v509_v41, %v509_v41 }
 0x80b   :  { %v515_v43 = vsel %vm101_vm1, %v511_v42, 0.0 }
 0x80c   :  { %516 = vadd.xlane.f32.xlu0 %v515_v43 }
 0x860   :  { %v514_v47 = vpop.xlane.xlu1 %513 }
 0x861   :  { %v518_v48 = vmul.f32 %v514_v47, %v1796_v32 }
 0x863   :  { %v520_v49 = vadd.f32 1e-12, %v518_v48 }
 0x865   :  { %1555 = vrsqrt.f32 %v520_v49  ;;  %vm528_vm13 = vweird.f32 %v520_v49 }
 0x86b   :  { %v1556_v50 = vpop.eup %1555 }
 0x86c   :  { %v523_v51 = vmul.f32 %v1556_v50, %v520_v49  ;;  %vm529_vm12 = vweird.f32 %v1556_v50 }
 0x86d   :  { %vm530_vm14 = vmor %vm528_vm13, %vm529_vm12 }
 0x86e   :  { %v524_v52 = vmul.f32 %v1556_v50, %v523_v51 }
 0x870   :  { %v525_v53 = vmul.f32 0.5, %v524_v52 }
 0x872   :  { %v526_v54 = vsub.f32 1.5, %v525_v53 }
 0x874   :  { %v527_v55 = vmul.f32 %v1556_v50, %v526_v54 }
 0x876   :  { %v531_v57 = vsel %vm530_vm14, %v1556_v50, %v527_v55 }
 0x877   :  { %v542_v60 = vmul.f32 %v531_v57, %v508_v37 }
 0x879   :  { %v545_v62 = vmul.f32 %v544_v56, %v542_v60 }
 0x87b   :  { %v1926_v63 = vadd.f32 %v547_v61, %v545_v62 }
 0x87d   :  { %1468 = vmatmul.msk.f32.vlgmr.msra.gmra.mxu1 %vm101_vm1, %v1926_v63 }
 0x87f   :  { %v517_v0 = vpop.xlane.xlu0 %516 }
 0x880   :  { %v519_v1 = vmul.f32 %v517_v0, %v1796_v32 }
 0x882   :  { %v521_v2 = vadd.f32 1e-12, %v519_v1 }
 0x884   :  { %1557 = vrsqrt.f32 %v521_v2  ;;  %vm538_vm0 = vweird.f32 %v521_v2 }
 0x88a   :  { %v1558_v3 = vpop.eup %1557 }
 0x88b   :  { %v533_v4 = vmul.f32 %v1558_v3, %v521_v2  ;;  %vm539_vm15 = vweird.f32 %v1558_v3 }
 0x88c   :  { %vm540_vm2 = vmor %vm538_vm0, %vm539_vm15 }
 0x88d   :  { %v534_v5 = vmul.f32 %v1558_v3, %v533_v4 }
 0x88f   :  { %v535_v6 = vmul.f32 0.5, %v534_v5 }
 0x891   :  { %v536_v7 = vsub.f32 1.5, %v535_v6 }
 0x893   :  { %v537_v8 = vmul.f32 %v1558_v3, %v536_v7 }
 0x895   :  { %v541_v9 = vsel %vm540_vm2, %v1558_v3, %v537_v8 }
 0x896   :  { %v543_v10 = vmul.f32 %v541_v9, %v509_v41 }
 0x898   :  { %v546_v11 = vmul.f32 %v544_v56, %v543_v10 }
 0x89a   :  { %v1931_v12 = vadd.f32 %v547_v61, %v546_v11 }
 0x89c   :  { %1469 = vmatmul.msk.f32.gmra.mxu1 %vm101_vm1, %v1931_v12 }
 0x8fa   :  { %v578_v14 = vpop.f32.mrf.mxu1 }
 0x8fb   :  { %v1936_v15 = vadd.f32 %v578_v14, %v554_v13 }
 0x8fd   :  { %v1939_v16 = vmul.f32 0.70710677, %v1936_v15  ;;  %v584_v2 = vmul.f32 0.5, %v1936_v15 }
 0x8ff   :  { %v588_v17 = vand.u32 2147483647, %v1939_v16  ;;  %vm654_vm9 = vcmp.lt.f32.partialorder %v1939_v16, 0.0 }
 0x901   :  { %v590_v18 = vmul.f32 0.3275911, %v588_v17  ;;  %v642_v40 = vsub.f32 0.0, %v588_v17 }
 0x903   :  { %v592_v19 = vadd.f32 1.0, %v590_v18  ;;  %v644_v42 = vmul.f32 %v642_v40, %v588_v17 }
 0x905   :  { %1559 = vrcp.f32 %v592_v19  ;;  %v605_v30 = vand.u32 2147483648, %v592_v19  ;;  %v603_v33 = vand.u32 2147483647, %v592_v19  ;;  %vm599_vm4 = vweird.f32 %v592_v19 }
 0x906   :  { %v646_v47 = vmul.f32 1.442695, %v644_v42 }
 0x907   :  { %v606_v37 = vor.u32 1.1754944e-38, %v605_v30  ;;  %vm604_vm6 = vcmp.eq.f32.partialorder %v603_v33, 8.507059e+37 }
 0x908   :  { %1561 = vpow2.f32 %v646_v47 }
 0x90b   :  { %v1560_v25 = vpop.eup %1559 }
 0x90c   :  { %v595_v26 = vmul.f32 %v1560_v25, %v592_v19  ;;  %vm600_vm3 = vweird.f32 %v1560_v25 }
 0x90d   :  { %vm601_vm5 = vmor %vm599_vm4, %vm600_vm3 }
 0x90e   :  { %v596_v28 = vsub.f32 1.0, %v595_v26  ;;  %v1562_v56 = vpop.eup %1561 }
 0x910   :  { %v597_v31 = vmul.f32 %v1560_v25, %v596_v28 }
 0x912   :  { %v598_v36 = vadd.f32 %v1560_v25, %v597_v31 }
 0x914   :  { %v602_v38 = vsel %vm601_vm5, %v1560_v25, %v598_v36  ;;  %v672_v36 = vperm.slane %v1829_v59, 5 }
 0x915   :  { %v607_v39 = vsel %vm604_vm6, %v606_v37, %v602_v38 }
 0x916   :  { %v624_v58 = vmul.f32 1.0614054, %v607_v39 }
 0x918   :  { %v626_v41 = vadd.f32 -1.4531521, %v624_v58 }
 0x919   :  { %v581_v43 = vpop.f32.mrf.mxu1 }
 0x91a   :  { %v628_v23 = vmul.f32 %v626_v41, %v607_v39  ;;  %v582_v44 = vadd.f32 %v581_v43, %v554_v13 }
 0x91c   :  { %v630_v45 = vadd.f32 1.4214138, %v628_v23  ;;  %v587_v46 = vmul.f32 0.70710677, %v582_v44  ;;  %v585_v33 = vmul.f32 0.5, %v582_v44 }
 0x91e   :  { %v632_v48 = vmul.f32 %v630_v45, %v607_v39  ;;  %v589_v49 = vand.u32 2147483647, %v587_v46  ;;  %vm655_vm15 = vcmp.lt.f32.partialorder %v587_v46, 0.0 }
 0x920   :  { %v634_v50 = vadd.f32 -0.28449672, %v632_v48  ;;  %v591_v51 = vmul.f32 0.3275911, %v589_v49  ;;  %v643_v13 = vsub.f32 0.0, %v589_v49 }
 0x922   :  { %v636_v52 = vmul.f32 %v634_v50, %v607_v39  ;;  %v593_v53 = vadd.f32 1.0, %v591_v51  ;;  %v645_v17 = vmul.f32 %v643_v13, %v589_v49 }
 0x924   :  { %v638_v54 = vadd.f32 0.2548296, %v636_v52  ;;  %1563 = vrcp.f32 %v593_v53  ;;  %v620_v4 = vand.u32 2147483648, %v593_v53  ;;  %v618_v7 = vand.u32 2147483647, %v593_v53  ;;  %v1475_v52 = vld [vmem:[%s2157_s4 + $0x30] sm:$0xff] }
 0x925   :  { %vm614_vm12 = vweird.f32 %v593_v53  ;;  %v648_v20 = vmul.f32 1.442695, %v645_v17 }
 0x926   :  { %v640_v55 = vmul.f32 %v638_v54, %v607_v39  ;;  %v621_v10 = vor.u32 1.1754944e-38, %v620_v4  ;;  %vm619_vm14 = vcmp.eq.f32.partialorder %v618_v7, 8.507059e+37  ;;  %v1473_v54 = vld [vmem:[%s2157_s4 + $0x20] sm:$0xff] }
 0x927   :  { %1565 = vpow2.f32 %v648_v20 }
 0x928   :  { %v650_v57 = vmul.f32 %v1562_v56, %v640_v55 }
 0x92a   :  { %v1564_v60 = vpop.eup %1563  ;;  %v652_v61 = vsub.f32 1.0, %v650_v57 }
 0x92b   :  { %v610_v62 = vmul.f32 %v1564_v60, %v593_v53  ;;  %vm615_vm10 = vweird.f32 %v1564_v60  ;;  %v1474_v53 = vld [vmem:[%s2157_s4 + $0x28] sm:$0xff] }
 0x92c   :  { %v656_v0 = vsub.f32 0.0, %v652_v61  ;;  %vm616_vm13 = vmor %vm614_vm12, %vm615_vm10 }
 0x92d   :  { %v611_v1 = vsub.f32 1.0, %v610_v62  ;;  %v1566_v27 = vpop.eup %1565 }
 0x92e   :  { %v658_v3 = vsel %vm654_vm9, %v656_v0, %v652_v61 }
 0x92f   :  { %v660_v5 = vadd.f32 1.0, %v658_v3  ;;  %v612_v6 = vmul.f32 %v1564_v60, %v611_v1  ;;  %v749_v3 = vperm.slane %v1829_v59, 6 }
 0x931   :  { %v662_v8 = vmul.f32 %v660_v5, %v584_v2  ;;  %v613_v9 = vadd.f32 %v1564_v60, %v612_v6  ;;  %v752_v6 = vperm.slane %v1829_v59, 7 }
 0x933   :  { %1470 = vmatmul.msk.f32.vlgmr.msra.gmra.mxu3 %vm673_vm11, %v662_v8  ;;  %v617_v11 = vsel %vm616_vm13, %v1564_v60, %v613_v9 }
 0x934   :  { %v622_v14 = vsel %vm619_vm14, %v621_v10, %v617_v11 }
 0x935   :  { %v625_v16 = vmul.f32 1.0614054, %v622_v14 }
 0x937   :  { %v627_v15 = vadd.f32 -1.4531521, %v625_v16 }
 0x939   :  { %v629_v18 = vmul.f32 %v627_v15, %v622_v14 }
 0x93b   :  { %v631_v19 = vadd.f32 1.4214138, %v629_v18 }
 0x93d   :  { %v633_v21 = vmul.f32 %v631_v19, %v622_v14 }
 0x93f   :  { %v635_v22 = vadd.f32 -0.28449672, %v633_v21 }
 0x941   :  { %v637_v24 = vmul.f32 %v635_v22, %v622_v14  ;;  %v2006_v22 = vld [vmem:[%s2161_s8 + $0x8] sm:$0xff] }
 0x943   :  { %v639_v25 = vadd.f32 0.2548296, %v637_v24  ;;  %v762_v24 = vperm.slane %v2006_v22, 0 }
 0x945   :  { %v641_v26 = vmul.f32 %v639_v25, %v622_v14 }
 0x947   :  { %v651_v28 = vmul.f32 %v1566_v27, %v641_v26 }
 0x949   :  { %v653_v29 = vsub.f32 1.0, %v651_v28 }
 0x94b   :  { %v657_v30 = vsub.f32 0.0, %v653_v29 }
 0x94d   :  { %v659_v31 = vsel %vm655_vm15, %v657_v30, %v653_v29 }
 0x94e   :  { %v661_v34 = vadd.f32 1.0, %v659_v31 }
 0x950   :  { %v663_v35 = vmul.f32 %v661_v34, %v585_v33 }
 0x952   :  { %1471 = vmatmul.msk.f32.gmra.mxu3 %vm673_vm11, %v663_v35 }
 0x9b6   :  { %v697_v37 = vpop.f32.mrf.mxu3 }
 0x9b7   :  { %v698_v38 = vadd.f32 %v697_v37, %v672_v36 }
 0x9b9   :  { %v703_v39 = vadd.f32 %v698_v38, %v1926_v63 }
 0x9bb   :  { %v705_v40 = vsel %vm101_vm1, %v703_v39, 0.0 }
 0x9bc   :  { %706 = vadd.xlane.f32.xlu2 %v705_v40 }
 0x9d5   :  { %v700_v58 = vpop.f32.mrf.mxu3 }
 0x9d6   :  { %v701_v41 = vadd.f32 %v700_v58, %v672_v36 }
 0x9d8   :  { %v704_v42 = vadd.f32 %v701_v41, %v1931_v12  ;;  %v1476_v12 = vld [vmem:[%s2157_s4 + $0x38] sm:$0xff] }
 0x9d9   :  { %781 = vmatpush.msra.mxu2 %v1476_v12 }
 0x9da   :  { %v708_v43 = vsel %vm101_vm1, %v704_v42, 0.0 }
 0x9db   :  { %709 = vadd.xlane.f32.xlu0 %v708_v43  ;;  %782 = vmatpush.msra.mxu2 %v1475_v52 }
 0x9dd   :  { %783 = vmatpush.msra.mxu2 %v1474_v53 }
 0x9df   :  { %784 = vmatpush.msra.mxu2 %v1473_v54 }
 0xa2f   :  { %v707_v23 = vpop.xlane.xlu2 %706 }
 0xa30   :  { %v711_v44 = vmul.f32 %v707_v23, %v1796_v32 }
 0xa32   :  { %v713_v45 = vsub.f32 %v703_v39, %v711_v44 }
 0xa34   :  { %v715_v46 = vmul.f32 %v713_v45, %v713_v45 }
 0xa36   :  { %v717_v47 = vsel %vm101_vm1, %v715_v46, 0.0 }
 0xa37   :  { %718 = vadd.xlane.f32.xlu2 %v717_v47 }
 0xa4e   :  { %v710_v48 = vpop.xlane.xlu0 %709 }
 0xa4f   :  { %v712_v63 = vmul.f32 %v710_v48, %v1796_v32 }
 0xa51   :  { %v714_v49 = vsub.f32 %v704_v42, %v712_v63 }
 0xa53   :  { %v716_v50 = vmul.f32 %v714_v49, %v714_v49 }
 0xa55   :  { %v720_v51 = vsel %vm101_vm1, %v716_v50, 0.0 }
 0xa56   :  { %721 = vadd.xlane.f32.xlu0 %v720_v51 }
 0xaaa   :  { %v719_v55 = vpop.xlane.xlu2 %718 }
 0xaab   :  { %v723_v56 = vmul.f32 %v719_v55, %v1796_v32 }
 0xaad   :  { %v725_v57 = vadd.f32 1e-12, %v723_v56 }
 0xaaf   :  { %1567 = vrsqrt.f32 %v725_v57  ;;  %vm733_vm2 = vweird.f32 %v725_v57 }
 0xab5   :  { %v1568_v60 = vpop.eup %1567 }
 0xab6   :  { %v728_v61 = vmul.f32 %v1568_v60, %v725_v57  ;;  %vm734_vm0 = vweird.f32 %v1568_v60 }
 0xab7   :  { %vm735_vm3 = vmor %vm733_vm2, %vm734_vm0 }
 0xab8   :  { %v729_v62 = vmul.f32 %v1568_v60, %v728_v61 }
 0xaba   :  { %v730_v0 = vmul.f32 0.5, %v729_v62 }
 0xabc   :  { %v731_v1 = vsub.f32 1.5, %v730_v0 }
 0xabe   :  { %v732_v2 = vmul.f32 %v1568_v60, %v731_v1 }
 0xac0   :  { %v736_v4 = vsel %vm735_vm3, %v1568_v60, %v732_v2 }
 0xac1   :  { %v747_v5 = vmul.f32 %v736_v4, %v713_v45 }
 0xac3   :  { %v750_v7 = vmul.f32 %v749_v3, %v747_v5 }
 0xac5   :  { %v1994_v8 = vadd.f32 %v752_v6, %v750_v7 }
 0xac7   :  { %1477 = vmatmul.msk.f32.vlgmr.msra.gmra.mxu2 %vm101_vm1, %v1994_v8 }
 0xac9   :  { %v722_v9 = vpop.xlane.xlu0 %721 }
 0xaca   :  { %v724_v10 = vmul.f32 %v722_v9, %v1796_v32 }
 0xacc   :  { %v726_v11 = vadd.f32 1e-12, %v724_v10 }
 0xace   :  { %1569 = vrsqrt.f32 %v726_v11  ;;  %vm743_vm5 = vweird.f32 %v726_v11 }
 0xad4   :  { %v1570_v13 = vpop.eup %1569 }
 0xad5   :  { %v738_v14 = vmul.f32 %v1570_v13, %v726_v11  ;;  %vm744_vm4 = vweird.f32 %v1570_v13 }
 0xad6   :  { %vm745_vm6 = vmor %vm743_vm5, %vm744_vm4 }
 0xad7   :  { %v739_v16 = vmul.f32 %v1570_v13, %v738_v14 }
 0xad9   :  { %v740_v15 = vmul.f32 0.5, %v739_v16 }
 0xadb   :  { %v741_v17 = vsub.f32 1.5, %v740_v15 }
 0xadd   :  { %v742_v18 = vmul.f32 %v1570_v13, %v741_v17 }
 0xadf   :  { %v746_v59 = vsel %vm745_vm6, %v1570_v13, %v742_v18 }
 0xae0   :  { %v748_v19 = vmul.f32 %v746_v59, %v714_v49  ;;  %v1494_v59 = vld [vmem:[%s2158_s5 + $0x38] sm:$0xff] }
 0xae2   :  { %v751_v20 = vmul.f32 %v749_v3, %v748_v19  ;;  %v1493_v19 = vld [vmem:[%s2158_s5 + $0x30] sm:$0xff] }
 0xae4   :  { %v1999_v21 = vadd.f32 %v752_v6, %v751_v20  ;;  %v1492_v20 = vld [vmem:[%s2158_s5 + $0x28] sm:$0xff] }
 0xae6   :  { %1478 = vmatmul.msk.f32.gmra.mxu2 %vm101_vm1, %v1999_v21 }
 0xb4a   :  { %v786_v25 = vpop.f32.mrf.mxu2 }
 0xb4b   :  { %v787_v26 = vadd.f32 %v786_v25, %v762_v24  ;;  %v1491_v25 = vld [vmem:[%s2158_s5 + $0x20] sm:$0xff] }
 0xb4d   :  { %856 = vrot.lane.b32.xlu0 %v787_v26, %s1667_s2  ;;  %858 = vrot.lane.b32.xlu2 %v787_v26, %s1669_s20 }
 0xb4e   :  { %793 = vrot.lane.b32.xlu1 %v787_v26, %s1666_s3 }
 0xb69   :  { %v789_v27 = vpop.f32.mrf.mxu2 }
 0xb6a   :  { %v790_v28 = vadd.f32 %v789_v27, %v762_v24 }
 0xb6c   :  { %992 = vrot.lane.b32.xlu0 %v790_v28, %s1669_s20  ;;  %927 = vrot.lane.b32.xlu2 %v790_v28, %s1666_s3 }
 0xb6d   :  { %990 = vrot.lane.b32.xlu1 %v790_v28, %s1667_s2 }
 0xba7   :  { %v859_v29 = vpop.permute.xlu2 %858 }
 0xba8   :  { %1482 = vmatpush.xpose.msk.msrb.mxu0 %vm197_vm7, %v859_v29 }
 0xbbf   :  { %v857_v30 = vpop.permute.xlu0 %856 }
 0xbc0   :  { %v794_v31 = vpop.permute.xlu1 %793  ;;  %1483 = vmatmul.msk.f32.vlgmr.msrb.gmra.mxu0 %vm197_vm7, %v857_v30 }
 0xbc1   :  { %1479 = vmatpush.xpose.msk.msrb.mxu3 %vm197_vm7, %v794_v31  ;;  %v1065_v31 = vperm.slane %v2006_v22, 1 }
 0xbc4   :  { %1480 = vmatmul.msk.f32.vlgmr.msrb.gmra.mxu3 %vm197_vm7, %v787_v26 }
 0xbc6   :  { %v928_v33 = vpop.permute.xlu2 %927 }
 0xbc7   :  { %1485 = vmatpush.xpose.msk.msra.mxu3 %vm197_vm7, %v928_v33 }
 0xbcb   :  { %1084 = vmatpush.msrb.mxu3 %v1494_v59 }
 0xbcc   :  { %1486 = vmatmul.msk.f32.vlgmr.msra.gmra.mxu3 %vm197_vm7, %v790_v28 }
 0xbcd   :  { %1085 = vmatpush.msrb.mxu3 %v1493_v19 }
 0xbcf   :  { %1086 = vmatpush.msrb.mxu3 %v1492_v20 }
 0xbd1   :  { %1087 = vmatpush.msrb.mxu3 %v1491_v25 }
 0xbde   :  { %v993_v34 = vpop.permute.xlu0 %992 }
 0xbdf   :  { %1488 = vmatpush.xpose.msk.msra.mxu0 %vm197_vm7, %v993_v34  ;;  %v991_v35 = vpop.permute.xlu1 %990 }
 0xbe2   :  { %1489 = vmatmul.msk.f32.vlgmr.msra.gmra.mxu0 %vm197_vm7, %v991_v35 }
 0xc3d   :  { %v881_v36 = vpop.f32.mrf.mxu0 }
 0xc3e   :  { %v884_v37 = vsel %vm222_vm8, %v881_v36, -inf }
 0xc3f   :  { %885 = vmax.xlane.f32.xlu1 %v884_v37 }
 0xc47   :  { %v816_v38 = vpop.f32.mrf.mxu3 }
 0xc48   :  { %v819_v39 = vsel %vm222_vm8, %v816_v38, -inf }
 0xc49   :  { %820 = vmax.xlane.f32.xlu0 %v819_v39 }
 0xc4f   :  { %v950_v40 = vpop.f32.mrf.mxu3 }
 0xc50   :  { %v953_v58 = vsel %vm222_vm8, %v950_v40, -inf }
 0xc51   :  { %954 = vmax.xlane.f32.xlu0 %v953_v58 }
 0xc5f   :  { %v1015_v41 = vpop.f32.mrf.mxu0 }
 0xc60   :  { %v1018_v42 = vsel %vm222_vm8, %v1015_v41, -inf }
 0xc61   :  { %1019 = vmax.xlane.f32.xlu2 %v1018_v42 }
 0xc65   :  { %830 = vrot.lane.b32.xlu0 %v787_v26, %s1668_s19 }
 0xcb2   :  { %v886_v43 = vpop.xlane.xlu1 %885 }
 0xcb3   :  { %v887_v23 = vsub.f32 %v881_v36, %v886_v43 }
 0xcb5   :  { %v888_v44 = vmul.f32 1.442695, %v887_v23 }
 0xcb7   :  { %1571 = vpow2.f32 %v888_v44 }
 0xcbc   :  { %v821_v45 = vpop.xlane.xlu0 %820 }
 0xcbd   :  { %v1572_v46 = vpop.eup %1571  ;;  %v822_v47 = vsub.f32 %v816_v38, %v821_v45 }
 0xcbe   :  { %v890_v48 = vsel %vm222_vm8, %v1572_v46, 0.0 }
 0xcbf   :  { %v823_v63 = vmul.f32 1.442695, %v822_v47  ;;  %891 = vadd.xlane.f32.xlu2 %v890_v48  ;;  %v1499_v48 = vld [vmem:[%s2159_s6 + $0x30] sm:$0xff] }
 0xcc1   :  { %1573 = vpow2.f32 %v823_v63  ;;  %v1498_v63 = vld [vmem:[%s2159_s6 + $0x28] sm:$0xff] }
 0xcc4   :  { %v955_v49 = vpop.xlane.xlu0 %954 }
 0xcc5   :  { %v956_v50 = vsub.f32 %v950_v40, %v955_v49  ;;  %v1497_v49 = vld [vmem:[%s2159_s6 + $0x20] sm:$0xff] }
 0xcc7   :  { %v1574_v51 = vpop.eup %1573  ;;  %v957_v12 = vmul.f32 1.442695, %v956_v50 }
 0xcc8   :  { %v825_v52 = vsel %vm222_vm8, %v1574_v51, 0.0 }
 0xcc9   :  { %1575 = vpow2.f32 %v957_v12  ;;  %826 = vadd.xlane.f32.xlu1 %v825_v52 }
 0xccf   :  { %v1576_v53 = vpop.eup %1575 }
 0xcd0   :  { %v959_v54 = vsel %vm222_vm8, %v1576_v53, 0.0 }
 0xcd1   :  { %960 = vadd.xlane.f32.xlu0 %v959_v54 }
 0xcd4   :  { %v1020_v55 = vpop.xlane.xlu2 %1019 }
 0xcd5   :  { %v1021_v56 = vsub.f32 %v1015_v41, %v1020_v55 }
 0xcd7   :  { %v1022_v57 = vmul.f32 1.442695, %v1021_v56  ;;  %v831_v60 = vpop.permute.xlu0 %830  ;;  %895 = vrot.lane.b32.xlu2 %v787_v26, %s1670_s1 }
 0xcd8   :  { %851 = vmatpush.msrb.mxu1 %v831_v60  ;;  %v1141_v60 = vperm.slane %v2006_v22, 2 }
 0xcd9   :  { %1577 = vpow2.f32 %v1022_v57 }
 0xcdf   :  { %v1578_v61 = vpop.eup %1577  ;;  %964 = vrot.lane.b32.xlu2 %v790_v28, %s1668_s19 }
 0xce0   :  { %v1024_v62 = vsel %vm222_vm8, %v1578_v61, 0.0 }
 0xce1   :  { %1025 = vadd.xlane.f32.xlu1 %v1024_v62 }
 0xcfa   :  { %1029 = vrot.lane.b32.xlu1 %v790_v28, %s1670_s1 }
 0xd32   :  { %v892_v0 = vpop.xlane.xlu2 %891 }
 0xd3a   :  { %v896_v1 = vpop.permute.xlu2 %895 }
 0xd3b   :  { %916 = vmatpush.msra.mxu1 %v896_v1 }
 0xd3c   :  { %v827_v2 = vpop.xlane.xlu1 %826 }
 0xd3d   :  { %1579 = vrcp.f32 %v827_v2 }
 0xd3e   :  { %1581 = vrcp.f32 %v892_v0  ;;  %v1144_v0 = vperm.slane %v2006_v22, 3 }
 0xd42   :  { %v965_v3 = vpop.permute.xlu2 %964 }
 0xd43   :  { %v1580_v4 = vpop.eup %1579  ;;  %985 = vmatpush.msrb.mxu2 %v965_v3 }
 0xd44   :  { %v829_v5 = vmul.f32 %v1580_v4, %v1574_v51  ;;  %v961_v6 = vpop.xlane.xlu0 %960  ;;  %v1582_v7 = vpop.eup %1581 }
 0xd45   :  { %1583 = vrcp.f32 %v961_v6  ;;  %v894_v10 = vmul.f32 %v1582_v7, %v1572_v46 }
 0xd46   :  { %1481 = vmatmul.msk.f32.vlgmr.msrb.gmra.mxu1 %vm222_vm8, %v829_v5 }
 0xd4b   :  { %v1584_v9 = vpop.eup %1583 }
 0xd4c   :  { %v963_v11 = vmul.f32 %v1584_v9, %v1576_v53 }
 0xd4e   :  { %1484 = vmatmul.msk.f32.vlgmr.msra.gmra.mxu1 %vm222_vm8, %v894_v10  ;;  %1487 = vmatmul.msk.f32.vlgmr.msrb.gmra.mxu2 %vm222_vm8, %v963_v11 }
 0xd54   :  { %v1026_v13 = vpop.xlane.xlu1 %1025 }
 0xd55   :  { %1585 = vrcp.f32 %v1026_v13 }
 0xd5b   :  { %v1586_v14 = vpop.eup %1585 }
 0xd5c   :  { %v1028_v16 = vmul.f32 %v1586_v14, %v1578_v61 }
 0xd6c   :  { %v1030_v15 = vpop.permute.xlu1 %1029 }
 0xd6d   :  { %1050 = vmatpush.msrb.mxu1 %v1030_v15 }
 0xd6e   :  { %1490 = vmatmul.msk.f32.vlgmr.msrb.gmra.mxu1 %vm222_vm8, %v1028_v16 }
 0xdc3   :  { %v853_v17 = vpop.f32.mrf.mxu1 }
 0xdcb   :  { %v918_v18 = vpop.f32.mrf.mxu1 }
 0xdcc   :  { %922 = vrot.lane.b32.xlu2 %v918_v18, %s1671_s21  ;;  %v1152_v18 = vperm.slane %v2006_v22, 4 }
 0xdd1   :  { %v987_v28 = vpop.f32.mrf.mxu2 }
 0xdeb   :  { %v1052_v24 = vpop.f32.mrf.mxu1 }
 0xdec   :  { %1056 = vrot.lane.b32.xlu1 %v1052_v24, %s1671_s21 }
 0xe26   :  { %v923_v26 = vpop.permute.xlu2 %922 }
 0xe27   :  { %v925_v27 = vsel %vm197_vm7, %v853_v17, %v923_v26 }
 0xe28   :  { %1495 = vmatmul.msk.f32.vlgmr.msrb.gmra.mxu3 %vm101_vm1, %v925_v27  ;;  %v1510_v27 = vld [vmem:[%s2160_s7 + $0x78] sm:$0xff] }
 0xe29   :  { %1286 = vmatpush.msrb.mxu0 %v1510_v27 }
 0xe5e   :  { %v1057_v29 = vpop.permute.xlu1 %1056 }
 0xe5f   :  { %v1059_v30 = vsel %vm197_vm7, %v987_v28, %v1057_v29  ;;  %v1509_v28 = vld [vmem:[%s2160_s7 + $0x70] sm:$0xff]  ;;  %v1508_v29 = vld [vmem:[%s2160_s7 + $0x68] sm:$0xff] }
 0xe60   :  { %1496 = vmatmul.msk.f32.gmra.mxu3 %vm101_vm1, %v1059_v30  ;;  %1287 = vmatpush.msrb.mxu0 %v1509_v28  ;;  %v1507_v30 = vld [vmem:[%s2160_s7 + $0x60] sm:$0xff] }
 0xe62   :  { %1288 = vmatpush.msrb.mxu0 %v1508_v29 }
 0xe64   :  { %1289 = vmatpush.msrb.mxu0 %v1507_v30 }
 0xeab   :  { %v1089_v33 = vpop.f32.mrf.mxu3 }
 0xeac   :  { %v1090_v34 = vadd.f32 %v1089_v33, %v1065_v31 }
 0xeae   :  { %v1095_v35 = vadd.f32 %v1090_v34, %v1994_v8  ;;  %v1506_v34 = vld [vmem:[%s2160_s7 + $0x58] sm:$0xff] }
 0xeaf   :  { %1290 = vmatpush.msrb.mxu0 %v1506_v34 }
 0xeb0   :  { %v1097_v36 = vsel %vm101_vm1, %v1095_v35, 0.0 }
 0xeb1   :  { %1098 = vadd.xlane.f32.xlu2 %v1097_v36  ;;  %v1505_v36 = vld [vmem:[%s2160_s7 + $0x50] sm:$0xff] }
 0xeb2   :  { %1291 = vmatpush.msrb.mxu0 %v1505_v36 }
 0xee3   :  { %v1092_v37 = vpop.f32.mrf.mxu3 }
 0xee4   :  { %v1093_v38 = vadd.f32 %v1092_v37, %v1065_v31 }
 0xee6   :  { %v1096_v39 = vadd.f32 %v1093_v38, %v1999_v21  ;;  %v1500_v21 = vld [vmem:[%s2159_s6 + $0x38] sm:$0xff]  ;;  %s1672_s6 = smov [#allocation2]  }
 0xee7   :  { %1171 = vmatpush.msra.mxu2 %v1500_v21  ;;  %s1416_s23 = sshll.u32 %s1672_s6, 4  ;;  %s1417_s23 = int_to_ptr.vmem [resolvable:$true] %s1416_s23 }
 0xee8   :  { %v1100_v40 = vsel %vm101_vm1, %v1096_v39, 0.0 }
 0xee9   :  { %1101 = vadd.xlane.f32.xlu1 %v1100_v40  ;;  %1172 = vmatpush.msra.mxu2 %v1499_v48  ;;  %v1504_v40 = vld [vmem:[%s2160_s7 + $0x48] sm:$0xff] }
 0xeea   :  { %1292 = vmatpush.msrb.mxu0 %v1504_v40 }
 0xeeb   :  { %1173 = vmatpush.msra.mxu2 %v1498_v63 }
 0xeed   :  { %1174 = vmatpush.msra.mxu2 %v1497_v49 }
 0xf24   :  { %v1099_v58 = vpop.xlane.xlu2 %1098 }
 0xf25   :  { %v1103_v41 = vmul.f32 %v1099_v58, %v1796_v32  ;;  %v1503_v58 = vld [vmem:[%s2160_s7 + $0x40] sm:$0xff] }
 0xf26   :  { %1293 = vmatpush.msrb.mxu0 %v1503_v58 }
 0xf27   :  { %v1105_v42 = vsub.f32 %v1095_v35, %v1103_v41 }
 0xf29   :  { %v1107_v43 = vmul.f32 %v1105_v42, %v1105_v42 }
 0xf2b   :  { %v1109_v23 = vsel %vm101_vm1, %v1107_v43, 0.0 }
 0xf2c   :  { %1110 = vadd.xlane.f32.xlu0 %v1109_v23 }
 0xf5c   :  { %v1102_v44 = vpop.xlane.xlu1 %1101 }
 0xf5d   :  { %v1104_v8 = vmul.f32 %v1102_v44, %v1796_v32 }
 0xf5f   :  { %v1106_v45 = vsub.f32 %v1096_v39, %v1104_v8 }
 0xf61   :  { %v1108_v46 = vmul.f32 %v1106_v45, %v1106_v45 }
 0xf63   :  { %v1112_v47 = vsel %vm101_vm1, %v1108_v46, 0.0 }
 0xf64   :  { %1113 = vadd.xlane.f32.xlu0 %v1112_v47 }
 0xf9f   :  { %v1111_v50 = vpop.xlane.xlu0 %1110 }
 0xfa0   :  { %v1115_v51 = vmul.f32 %v1111_v50, %v1796_v32 }
 0xfa2   :  { %v1117_v12 = vadd.f32 1e-12, %v1115_v51 }
 0xfa4   :  { %1587 = vrsqrt.f32 %v1117_v12  ;;  %vm1125_vm8 = vweird.f32 %v1117_v12 }
 0xfaa   :  { %v1588_v52 = vpop.eup %1587 }
 0xfab   :  { %v1120_v53 = vmul.f32 %v1588_v52, %v1117_v12  ;;  %vm1126_vm7 = vweird.f32 %v1588_v52 }
 0xfac   :  { %vm1127_vm9 = vmor %vm1125_vm8, %vm1126_vm7 }
 0xfad   :  { %v1121_v54 = vmul.f32 %v1588_v52, %v1120_v53 }
 0xfaf   :  { %v1122_v55 = vmul.f32 0.5, %v1121_v54 }
 0xfb1   :  { %v1123_v56 = vsub.f32 1.5, %v1122_v55 }
 0xfb3   :  { %v1124_v57 = vmul.f32 %v1588_v52, %v1123_v56 }
 0xfb5   :  { %v1128_v61 = vsel %vm1127_vm9, %v1588_v52, %v1124_v57 }
 0xfb6   :  { %v1139_v62 = vmul.f32 %v1128_v61, %v1105_v42 }
 0xfb8   :  { %v1142_v1 = vmul.f32 %v1141_v60, %v1139_v62 }
 0xfba   :  { %v2081_v2 = vadd.f32 %v1144_v0, %v1142_v1 }
 0xfbc   :  { %1501 = vmatmul.msk.f32.vlgmr.msra.gmra.mxu2 %vm101_vm1, %v2081_v2 }
 0xfd7   :  { %v1114_v3 = vpop.xlane.xlu0 %1113 }
 0xfd8   :  { %v1116_v4 = vmul.f32 %v1114_v3, %v1796_v32 }
 0xfda   :  { %v1118_v5 = vadd.f32 1e-12, %v1116_v4 }
 0xfdc   :  { %1589 = vrsqrt.f32 %v1118_v5  ;;  %vm1135_vm12 = vweird.f32 %v1118_v5 }
 0xfe2   :  { %v1590_v6 = vpop.eup %1589 }
 0xfe3   :  { %v1130_v7 = vmul.f32 %v1590_v6, %v1118_v5  ;;  %vm1136_vm10 = vweird.f32 %v1590_v6 }
 0xfe4   :  { %vm1137_vm13 = vmor %vm1135_vm12, %vm1136_vm10 }
 0xfe5   :  { %v1131_v9 = vmul.f32 %v1590_v6, %v1130_v7 }
 0xfe7   :  { %v1132_v10 = vmul.f32 0.5, %v1131_v9 }
 0xfe9   :  { %v1133_v11 = vsub.f32 1.5, %v1132_v10 }
 0xfeb   :  { %v1134_v13 = vmul.f32 %v1590_v6, %v1133_v11 }
 0xfed   :  { %v1138_v14 = vsel %vm1137_vm13, %v1590_v6, %v1134_v13 }
 0xfee   :  { %v1140_v16 = vmul.f32 %v1138_v14, %v1106_v45 }
 0xff0   :  { %v1143_v15 = vmul.f32 %v1141_v60, %v1140_v16 }
 0xff2   :  { %v2086_v17 = vadd.f32 %v1144_v0, %v1143_v15 }
 0xff4   :  { %1502 = vmatmul.msk.f32.gmra.mxu2 %vm101_vm1, %v2086_v17 }
0x103f   :  { %v1176_v59 = vpop.f32.mrf.mxu2 }
0x1040   :  { %v1177_v19 = vadd.f32 %v1176_v59, %v1152_v18 }
0x1042   :  { %v1184_v20 = vmul.f32 0.70710677, %v1177_v19  ;;  %v1182_v57 = vmul.f32 0.5, %v1177_v19 }
0x1044   :  { %v1186_v24 = vand.u32 2147483647, %v1184_v20  ;;  %vm1252_vm3 = vcmp.lt.f32.partialorder %v1184_v20, 0.0 }
0x1046   :  { %v1188_v25 = vmul.f32 0.3275911, %v1186_v24  ;;  %v1240_v44 = vsub.f32 0.0, %v1186_v24 }
0x1048   :  { %v1190_v26 = vadd.f32 1.0, %v1188_v25  ;;  %v1242_v46 = vmul.f32 %v1240_v44, %v1186_v24 }
0x104a   :  { %1591 = vrcp.f32 %v1190_v26  ;;  %v1203_v37 = vand.u32 2147483648, %v1190_v26  ;;  %v1201_v39 = vand.u32 2147483647, %v1190_v26  ;;  %vm1197_vm15 = vweird.f32 %v1190_v26 }
0x104b   :  { %v1244_v48 = vmul.f32 1.442695, %v1242_v46 }
0x104c   :  { %v1204_v42 = vor.u32 1.1754944e-38, %v1203_v37  ;;  %vm1202_vm2 = vcmp.eq.f32.partialorder %v1201_v39, 8.507059e+37 }
0x104d   :  { %1593 = vpow2.f32 %v1244_v48 }
0x1050   :  { %v1592_v31 = vpop.eup %1591 }
0x1051   :  { %v1193_v33 = vmul.f32 %v1592_v31, %v1190_v26  ;;  %vm1198_vm14 = vweird.f32 %v1592_v31 }
0x1052   :  { %vm1199_vm0 = vmor %vm1197_vm15, %vm1198_vm14 }
0x1053   :  { %v1194_v35 = vsub.f32 1.0, %v1193_v33  ;;  %v1594_v52 = vpop.eup %1593 }
0x1055   :  { %v1195_v38 = vmul.f32 %v1592_v31, %v1194_v35 }
0x1057   :  { %v1196_v41 = vadd.f32 %v1592_v31, %v1195_v38 }
0x1059   :  { %v1200_v43 = vsel %vm1199_vm0, %v1592_v31, %v1196_v41  ;;  %v1271_v41 = vperm.slane %v2006_v22, 5 }
0x105a   :  { %v1205_v23 = vsel %vm1202_vm2, %v1204_v42, %v1200_v43 }
0x105b   :  { %v1222_v8 = vmul.f32 1.0614054, %v1205_v23 }
0x105d   :  { %v1224_v45 = vadd.f32 -1.4531521, %v1222_v8 }
0x105f   :  { %v1226_v47 = vmul.f32 %v1224_v45, %v1205_v23 }
0x1061   :  { %v1228_v21 = vadd.f32 1.4214138, %v1226_v47 }
0x1063   :  { %v1230_v63 = vmul.f32 %v1228_v21, %v1205_v23 }
0x1065   :  { %v1232_v49 = vadd.f32 -0.28449672, %v1230_v63 }
0x1067   :  { %v1234_v50 = vmul.f32 %v1232_v49, %v1205_v23 }
0x1069   :  { %v1236_v51 = vadd.f32 0.2548296, %v1234_v50 }
0x106b   :  { %v1238_v12 = vmul.f32 %v1236_v51, %v1205_v23 }
0x106d   :  { %v1248_v53 = vmul.f32 %v1594_v52, %v1238_v12 }
0x106f   :  { %v1250_v54 = vsub.f32 1.0, %v1248_v53 }
0x1071   :  { %v1254_v55 = vsub.f32 0.0, %v1250_v54 }
0x1073   :  { %v1256_v56 = vsel %vm1252_vm3, %v1254_v55, %v1250_v54  ;;  %v1355_v54 = vld [vmem:[%s2162_s9 + $0x10] sm:$0xff]  ;;  %v1354_v55 = vld [vmem:[%s2162_s9 + $0x8] sm:$0xff] }
0x1074   :  { %v1258_v60 = vadd.f32 1.0, %v1256_v56  ;;  %v1353_v56 = vld [vmem:[%s2162_s9] sm:$0xff] }
0x1076   :  { %v1260_v61 = vmul.f32 %v1258_v60, %v1182_v57 }
0x1077   :  { %v1179_v62 = vpop.f32.mrf.mxu2 }
0x1078   :  { %v1180_v0 = vadd.f32 %v1179_v62, %v1152_v18  ;;  %1511 = vmatmul.msk.f32.vlgmr.msrb.gmra.mxu0 %vm673_vm11, %v1260_v61 }
0x107a   :  { %v1185_v1 = vmul.f32 0.70710677, %v1180_v0  ;;  %v1183_v39 = vmul.f32 0.5, %v1180_v0 }
0x107c   :  { %v1187_v3 = vand.u32 2147483647, %v1185_v1  ;;  %vm1253_vm8 = vcmp.lt.f32.partialorder %v1185_v1, 0.0 }
0x107e   :  { %v1189_v4 = vmul.f32 0.3275911, %v1187_v3  ;;  %v1241_v18 = vsub.f32 0.0, %v1187_v3 }
0x1080   :  { %v1191_v5 = vadd.f32 1.0, %v1189_v4  ;;  %v1243_v24 = vmul.f32 %v1241_v18, %v1187_v3 }
0x1082   :  { %1595 = vrcp.f32 %v1191_v5  ;;  %v1218_v10 = vand.u32 2147483648, %v1191_v5  ;;  %v1216_v13 = vand.u32 2147483647, %v1191_v5  ;;  %vm1212_vm5 = vweird.f32 %v1191_v5 }
0x1083   :  { %v1246_v27 = vmul.f32 1.442695, %v1243_v24 }
0x1084   :  { %v1219_v16 = vor.u32 1.1754944e-38, %v1218_v10  ;;  %vm1217_vm7 = vcmp.eq.f32.partialorder %v1216_v13, 8.507059e+37  ;;  %v1350_v10 = vperm.slane %v2006_v22, 7 }
0x1085   :  { %1597 = vpow2.f32 %v1246_v27 }
0x1088   :  { %v1596_v6 = vpop.eup %1595 }
0x1089   :  { %v1208_v7 = vmul.f32 %v1596_v6, %v1191_v5  ;;  %vm1213_vm4 = vweird.f32 %v1596_v6 }
0x108a   :  { %vm1214_vm6 = vmor %vm1212_vm5, %vm1213_vm4 }
0x108b   :  { %v1209_v9 = vsub.f32 1.0, %v1208_v7  ;;  %v1598_v34 = vpop.eup %1597 }
0x108d   :  { %v1210_v11 = vmul.f32 %v1596_v6, %v1209_v9 }
0x108f   :  { %v1211_v14 = vadd.f32 %v1596_v6, %v1210_v11 }
0x1091   :  { %v1215_v15 = vsel %vm1214_vm6, %v1596_v6, %v1211_v14  ;;  %v1347_v6 = vperm.slane %v2006_v22, 6 }
0x1092   :  { %v1220_v59 = vsel %vm1217_vm7, %v1219_v16, %v1215_v15 }
0x1093   :  { %v1223_v19 = vmul.f32 1.0614054, %v1220_v59 }
0x1095   :  { %v1225_v20 = vadd.f32 -1.4531521, %v1223_v19 }
0x1097   :  { %v1227_v25 = vmul.f32 %v1225_v20, %v1220_v59 }
0x1099   :  { %v1229_v26 = vadd.f32 1.4214138, %v1227_v25 }
0x109b   :  { %v1231_v28 = vmul.f32 %v1229_v26, %v1220_v59 }
0x109d   :  { %v1233_v29 = vadd.f32 -0.28449672, %v1231_v28 }
0x109f   :  { %v1235_v30 = vmul.f32 %v1233_v29, %v1220_v59 }
0x10a1   :  { %v1237_v31 = vadd.f32 0.2548296, %v1235_v30 }
0x10a3   :  { %v1239_v33 = vmul.f32 %v1237_v31, %v1220_v59 }
0x10a5   :  { %v1249_v35 = vmul.f32 %v1598_v34, %v1239_v33 }
0x10a7   :  { %v1251_v36 = vsub.f32 1.0, %v1249_v35 }
0x10a9   :  { %v1255_v37 = vsub.f32 0.0, %v1251_v36 }
0x10ab   :  { %v1257_v38 = vsel %vm1253_vm8, %v1255_v37, %v1251_v36 }
0x10ac   :  { %v1259_v40 = vadd.f32 1.0, %v1257_v38 }
0x10ae   :  { %v1261_v58 = vmul.f32 %v1259_v40, %v1183_v39 }
0x10b0   :  { %1512 = vmatmul.msk.f32.gmra.mxu0 %vm673_vm11, %v1261_v58 }
0x10f5   :  { %v1295_v42 = vpop.f32.mrf.mxu0 }
0x10f6   :  { %v1296_v43 = vadd.f32 %v1295_v42, %v1271_v41 }
0x10f8   :  { %v1301_v23 = vadd.f32 %v1296_v43, %v2081_v2 }
0x10fa   :  { %v1303_v44 = vsel %vm101_vm1, %v1301_v23, 0.0 }
0x10fb   :  { %1304 = vadd.xlane.f32.xlu0 %v1303_v44 }
0x112d   :  { %v1298_v8 = vpop.f32.mrf.mxu0 }
0x112e   :  { %v1299_v45 = vadd.f32 %v1298_v8, %v1271_v41 }
0x1130   :  { %v1302_v46 = vadd.f32 %v1299_v45, %v2086_v17  ;;  %v1356_v17 = vld [vmem:[%s2162_s9 + $0x18] sm:$0xff] }
0x1131   :  { %1379 = vmatpush.msra.mxu1 %v1356_v17 }
0x1132   :  { %v1306_v47 = vsel %vm101_vm1, %v1302_v46, 0.0 }
0x1133   :  { %1307 = vadd.xlane.f32.xlu2 %v1306_v47  ;;  %1380 = vmatpush.msra.mxu1 %v1355_v54 }
0x1135   :  { %1381 = vmatpush.msra.mxu1 %v1354_v55 }
0x1137   :  { %1382 = vmatpush.msra.mxu1 %v1353_v56 }
0x116e   :  { %v1305_v21 = vpop.xlane.xlu0 %1304 }
0x116f   :  { %v1309_v48 = vmul.f32 %v1305_v21, %v1796_v32 }
0x1171   :  { %v1311_v63 = vsub.f32 %v1301_v23, %v1309_v48 }
0x1173   :  { %v1313_v49 = vmul.f32 %v1311_v63, %v1311_v63 }
0x1175   :  { %v1315_v50 = vsel %vm101_vm1, %v1313_v49, 0.0 }
0x1176   :  { %1316 = vadd.xlane.f32.xlu1 %v1315_v50 }
0x11a6   :  { %v1308_v51 = vpop.xlane.xlu2 %1307 }
0x11a7   :  { %v1310_v2 = vmul.f32 %v1308_v51, %v1796_v32 }
0x11a9   :  { %v1312_v12 = vsub.f32 %v1302_v46, %v1310_v2 }
0x11ab   :  { %v1314_v52 = vmul.f32 %v1312_v12, %v1312_v12 }
0x11ad   :  { %v1318_v53 = vsel %vm101_vm1, %v1314_v52, 0.0 }
0x11ae   :  { %1319 = vadd.xlane.f32.xlu0 %v1318_v53 }
0x11e9   :  { %v1317_v57 = vpop.xlane.xlu1 %1316 }
0x11ea   :  { %v1321_v60 = vmul.f32 %v1317_v57, %v1796_v32 }
0x11ec   :  { %v1323_v61 = vadd.f32 1e-12, %v1321_v60 }
0x11ee   :  { %1599 = vrsqrt.f32 %v1323_v61  ;;  %vm1331_vm9 = vweird.f32 %v1323_v61 }
0x11f4   :  { %v1600_v62 = vpop.eup %1599 }
0x11f5   :  { %v1326_v0 = vmul.f32 %v1600_v62, %v1323_v61  ;;  %vm1332_vm11 = vweird.f32 %v1600_v62 }
0x11f6   :  { %vm1333_vm10 = vmor %vm1331_vm9, %vm1332_vm11 }
0x11f7   :  { %v1327_v1 = vmul.f32 %v1600_v62, %v1326_v0 }
0x11f9   :  { %v1328_v3 = vmul.f32 0.5, %v1327_v1 }
0x11fb   :  { %v1329_v4 = vsub.f32 1.5, %v1328_v3 }
0x11fd   :  { %v1330_v5 = vmul.f32 %v1600_v62, %v1329_v4 }
0x11ff   :  { %v1334_v7 = vsel %vm1333_vm10, %v1600_v62, %v1330_v5 }
0x1200   :  { %v1345_v9 = vmul.f32 %v1334_v7, %v1311_v63 }
0x1202   :  { %v1348_v11 = vmul.f32 %v1347_v6, %v1345_v9 }
0x1204   :  { %v1351_v13 = vadd.f32 %v1350_v10, %v1348_v11 }
0x1206   :  { %1513 = vmatmul.msk.f32.vlgmr.msra.gmra.mxu1 %vm101_vm1, %v1351_v13 }
0x1221   :  { %v1320_v14 = vpop.xlane.xlu0 %1319 }
0x1222   :  { %v1322_v16 = vmul.f32 %v1320_v14, %v1796_v32  ;;  %v1532_v32 = vld [vmem:[%s2163_s10] ss:$0 sm:$0xff] }
0x1224   :  { %v1324_v15 = vadd.f32 1e-12, %v1322_v16 }
0x1226   :  { %1601 = vrsqrt.f32 %v1324_v15  ;;  %vm1341_vm13 = vweird.f32 %v1324_v15 }
0x122c   :  { %v1602_v18 = vpop.eup %1601 }
0x122d   :  { %v1336_v59 = vmul.f32 %v1602_v18, %v1324_v15  ;;  %vm1342_vm12 = vweird.f32 %v1602_v18 }
0x122e   :  { %vm1343_vm14 = vmor %vm1341_vm13, %vm1342_vm12 }
0x122f   :  { %v1337_v19 = vmul.f32 %v1602_v18, %v1336_v59 }
0x1231   :  { %v1338_v20 = vmul.f32 0.5, %v1337_v19 }
0x1233   :  { %v1339_v24 = vsub.f32 1.5, %v1338_v20 }
0x1235   :  { %v1340_v25 = vmul.f32 %v1602_v18, %v1339_v24 }
0x1237   :  { %v1344_v26 = vsel %vm1343_vm14, %v1602_v18, %v1340_v25 }
0x1238   :  { %v1346_v22 = vmul.f32 %v1344_v26, %v1312_v12 }
0x123a   :  { %v1349_v27 = vmul.f32 %v1347_v6, %v1346_v22 }
0x123c   :  { %v1352_v28 = vadd.f32 %v1350_v10, %v1349_v27 }
0x123e   :  { %1514 = vmatmul.msk.f32.gmra.mxu1 %vm101_vm1, %v1352_v28 }
0x1283   :  { %v1384_v29 = vpop.f32.mrf.mxu1 }
0x1284   :  { %v1385_v30 = vadd.f32 %v1532_v32, %v1384_v29 }
0x1286   :  { %1390 = vst [vmem:[#allocation2] sm:$0xff] %v1385_v30  ;;  %1392 = vmax.xlane.f32.xlu2 %v1385_v30 }
0x12bb   :  { %v1387_v31 = vpop.f32.mrf.mxu1 }
0x12bc   :  { %v1388_v33 = vadd.f32 %v1532_v32, %v1387_v31 }
0x12be   :  { %1391 = vst [vmem:[#allocation2 + $0x8] sm:$0xff] %v1388_v33  ;;  %1394 = vmax.xlane.f32.xlu1 %v1388_v33 }
0x12bf   :  { %1424 = dma.vmem_to_hbm [thread:$0]  %s1417_s23, 256, %s1419_s22, [#allocation3], %s1673_s24, %s1673_s24, %s1674_s25  }
0x12f9   :  { %v1393_v34 = vpop.xlane.xlu2 %1392 }
0x12fa   :  { %v1396_v35 = vsub.f32 %v1385_v30, %v1393_v34 }
0x12fc   :  { %v1398_v36 = vmul.f32 1.442695, %v1396_v35 }
0x12fe   :  { %1603 = vpow2.f32 %v1398_v36 }
0x1304   :  { %v1604_v37 = vpop.eup %1603 }
0x1305   :  { %1402 = vadd.xlane.f32.xlu0 %v1604_v37 }
0x1331   :  { %v1395_v38 = vpop.xlane.xlu1 %1394 }
0x1332   :  { %v1397_v39 = vsub.f32 %v1388_v33, %v1395_v38 }
0x1334   :  { %v1400_v40 = vmul.f32 1.442695, %v1397_v39 }
0x1336   :  { %1605 = vpow2.f32 %v1400_v40 }
0x133c   :  { %v1606_v58 = vpop.eup %1605 }
0x133d   :  { %1404 = vadd.xlane.f32.xlu2 %v1606_v58 }
0x1378   :  { %v1403_v41 = vpop.xlane.xlu0 %1402 }
0x1379   :  { %1607 = vrcp.f32 %v1403_v41 }
0x137f   :  { %v1608_v42 = vpop.eup %1607 }
0x1380   :  { %v1408_v43 = vmul.f32 %v1608_v42, %v1604_v37 }
0x1382   :  { %1410 = vst [vmem:[#allocation4] sm:$0xff] %v1408_v43 }
0x13b0   :  { %v1405_v23 = vpop.xlane.xlu2 %1404 }
0x13b1   :  { %1609 = vrcp.f32 %v1405_v23 }
0x13b7   :  { %v1610_v44 = vpop.eup %1609 }
0x13b8   :  { %v1409_v8 = vmul.f32 %v1610_v44, %v1606_v58 }
0x13ba   :  { %1411 = vst [vmem:[#allocation4 + $0x8] sm:$0xff] %v1409_v8 }
0x13bb   :  { %1437 = dma.vmem_to_hbm [thread:$0]  %s1430_s27, 256, %s1432_s29, [#allocation5], %s1673_s24, %s1673_s24, %s1674_s25  }
0x13bc   :  { %1659 = dma.done.wait [#allocation3], 256  }
0x13bd   :  { %1660 = vsyncadd [#allocation3], 4294967040 }
0x13be   :  { %1661 = dma.done.wait [#allocation5], 256  }
0x13bf   :  { %1662 = vsyncadd [#allocation5], 4294967040 }
0x13c0   :  { %1446 = vsyncpa [#allocation3], 1 }
0x13c1   :  { %1447 = vsyncpa [#allocation5], 1 }

</bundles_post_ra>
